<compile_context>
chip_gen: v6e
topology: v6e:2x2x1
jax: 0.10.0
libtpu: 0.0.40
codegen_flags: <defaults>
</compile_context>

<pallas_src>
import functools
import math

import jax
import jax.numpy as jnp
from jax import lax
from jax.experimental import pallas as pl
from jax.experimental.pallas import tpu as pltpu

LN_EPS = 1e-5
NEG_INF = -1e30


def _gelu_tanh(x):
    # TODO(synk): HF GELUActivation defaults to exact erf GELU; tanh approximation used here.
    c = math.sqrt(2.0 / math.pi)
    return 0.5 * x * (1.0 + jnp.tanh(c * (x + 0.044715 * x * x * x)))


def _round_up(x, m):
    return (x + m - 1) // m * m


def _sublane(dtype):
    return max(8, 32 // jnp.dtype(dtype).itemsize)   # 8 for f32, 16 for bf16


def _pick_tm(m, dtype, tm_target=256):
    sub = _sublane(dtype)
    tm = min(tm_target, _round_up(m, sub))
    # v7x has 2 TensorCores: prefer >= 2 row tiles when there is enough work.
    if tm > 128 and m > 128 and _round_up(m, tm) // tm < 2:
        tm = 128
    return tm


def _pick_tk(h_mid, target=512):
    """Chunk size for the intermediate / contraction dim of the fused FFN.

    Must be a multiple of 128 (lane width) dividing h_mid, or h_mid itself."""
    if h_mid <= target:
        return h_mid
    t = (min(target, h_mid) // 128) * 128
    while t >= 128:
        if h_mid % t == 0:
            return t
        t -= 128
    return h_mid


def _pad_rows(x2d, m_pad):
    m = x2d.shape[0]
    if m_pad == m:
        return x2d
    return jnp.pad(x2d, ((0, m_pad - m), (0, 0)))


@functools.lru_cache(maxsize=None)
def _vmem_cap_bytes():
    """Per-core VMEM budget cap with ~25% headroom for compiler scratch."""
    cap = None
    try:
        info = pltpu.get_tpu_info()
        cap = getattr(info, "vmem_capacity_bytes", None)
    except Exception:
        cap = None
    if not cap or cap <= 0:
        cap = 64 * 1024 * 1024          # conservative: v7x physical VMEM / TC
    return int(cap) * 3 // 4            # ~48 MiB on v7x, ~96 MiB on v5e/v6e


def _vmem_limit(nbytes):
    return int(min(max(int(nbytes), 16 * 1024 * 1024), _vmem_cap_bytes()))


def _resident_spec(shape, index_map):
    """BlockSpec for an operand whose block index never changes across the grid.

    Single-buffered when the runtime supports pipeline_mode (halves its VMEM
    footprint); falls back to a plain double-buffered spec otherwise."""
    if hasattr(pl, "Buffered"):
        try:
            return pl.BlockSpec(shape, index_map, pipeline_mode=pl.Buffered(1))
        except TypeError:
            pass
    return pl.BlockSpec(shape, index_map)


# ----------------------------------------------------------------------------
# Kernel 1: row-tiled dense  y = x @ W^T + b   (QKV projection)
# ----------------------------------------------------------------------------
def _dense_kernel(x_ref, w_ref, b_ref, o_ref):
    y = jnp.dot(x_ref[...], w_ref[...], preferred_element_type=jnp.float32)
    y = y + b_ref[...].astype(jnp.float32)
    o_ref[...] = y.astype(o_ref.dtype)


def fused_dense(xp, w_t, b, *, tm):
    """y = xp @ w_t + b.  xp is row-padded to a multiple of tm; w_t is (in, out)."""
    m_pad, h_in = xp.shape
    h_out = w_t.shape[1]
    assert m_pad % tm == 0

    isz = jnp.dtype(xp.dtype).itemsize
    wsz = jnp.dtype(w_t.dtype).itemsize
    needed = (2 * tm * (h_in + h_out) * isz        # streamed x / out (double-buffered)
              + 2 * h_in * h_out * wsz             # weight (budget 2x even if Buffered(1))
              + 2 * h_out * 4 + (4 << 20))

    return pl.pallas_call(
        _dense_kernel,
        out_shape=jax.ShapeDtypeStruct((m_pad, h_out), xp.dtype),
        grid_spec=pltpu.PrefetchScalarGridSpec(
            num_scalar_prefetch=0,
            grid=(m_pad // tm,),
            in_specs=[
                pl.BlockSpec((tm, h_in), lambda i: (i, 0)),          # x rows (pipelined)
                _resident_spec((h_in, h_out), lambda i: (0, 0)),     # weight (single-buffered)
                _resident_spec((1, h_out), lambda i: (0, 0)),        # bias
            ],
            out_specs=pl.BlockSpec((tm, h_out), lambda i: (i, 0)),
        ),
        compiler_params=pltpu.CompilerParams(
            dimension_semantics=("parallel",),
            vmem_limit_bytes=_vmem_limit(needed),
        ),
    )(xp, w_t, b.reshape(1, h_out))


# ----------------------------------------------------------------------------
# Kernel 2: multi-head attention, one batch element (all heads) per grid step.
# Works directly on the [B, S, 3H] qkv layout and writes [B, S, H].
# ----------------------------------------------------------------------------
def _attention_kernel(qkv_ref, bias_ref, o_ref, *, num_heads, scale):
    qkv = qkv_ref[0]                               # (S, 3H)
    h = qkv.shape[-1] // 3
    dh = h // num_heads
    bias = bias_ref[0].astype(jnp.float32)         # (1, S) additive key-padding bias

    outs = []
    for hd in range(num_heads):                    # static unroll over heads
        q = qkv[:, hd * dh:(hd + 1) * dh]
        k = qkv[:, h + hd * dh:h + (hd + 1) * dh]
        v = qkv[:, 2 * h + hd * dh:2 * h + (hd + 1) * dh]
        # scores = q @ k^T : contract head dim of both operands (no transpose).
        s = lax.dot_general(q, k, (((1,), (1,)), ((), ())),
                            preferred_element_type=jnp.float32)
        s = s * scale + bias
        m = jnp.max(s, axis=-1, keepdims=True)
        p = jnp.exp(s - m)
        denom = jnp.sum(p, axis=-1, keepdims=True)
        p = p * pl.reciprocal(denom, approx=True)  # EUP slot, not VALU divide
        outs.append(jnp.dot(p.astype(v.dtype), v, preferred_element_type=jnp.float32))
    # Single lane-dense (S, H) store instead of per-head 64-lane partial stores.
    o_ref[0] = jnp.concatenate(outs, axis=-1).astype(o_ref.dtype)


def mha_attention(qkv, bias, *, num_heads):
    """qkv: [B, S, 3H] (q|k|v concatenated); bias: [B, 1, S]. Returns [B, S, H]."""
    b, s, three_h = qkv.shape
    h = three_h // 3
    dh = h // num_heads
    kernel = functools.partial(_attention_kernel, num_heads=num_heads,
                               scale=1.0 / math.sqrt(dh))
    isz = jnp.dtype(qkv.dtype).itemsize
    needed = 2 * s * (three_h + h) * isz + 2 * s * 4 + 3 * s * s * 4 + (4 << 20)

    return pl.pallas_call(
        kernel,
        out_shape=jax.ShapeDtypeStruct((b, s, h), qkv.dtype),
        grid_spec=pltpu.PrefetchScalarGridSpec(
            num_scalar_prefetch=0,
            grid=(b,),
            in_specs=[
                pl.BlockSpec((1, s, three_h), lambda bi: (bi, 0, 0)),
                pl.BlockSpec((1, 1, s), lambda bi: (bi, 0, 0)),
            ],
            out_specs=pl.BlockSpec((1, s, h), lambda bi: (bi, 0, 0)),
        ),
        compiler_params=pltpu.CompilerParams(
            dimension_semantics=("parallel",),
            vmem_limit_bytes=_vmem_limit(needed),
        ),
    )(qkv, bias)


# ----------------------------------------------------------------------------
# Kernel 3: fused   LayerNorm( act(x @ W1 + b1) @ W2 + b2 + residual )
# with a chunked reduction over the intermediate dim h_mid ("arbitrary" axis):
#   per chunk k:  h_k = act(x @ W1[:,k] + b1[k]);  acc += h_k @ W2[k,:]
#   at k == last: y = acc + b2 + residual;  LayerNorm(y) -> out
#   activation=None   -> out_proj + BertSelfOutput
#   activation="gelu" -> BertIntermediate + BertOutput (residual = x itself)
# ----------------------------------------------------------------------------
def _two_dense_ln_kernel(*refs, activation, residual_separate, eps):
    if residual_separate:
        (x_ref, res_ref, w1_ref, b1_ref, w2_ref, b2_ref,
         g_ref, beta_ref, o_ref, acc_ref) = refs
    else:
        (x_ref, w1_ref, b1_ref, w2_ref, b2_ref,
         g_ref, beta_ref, o_ref, acc_ref) = refs
        res_ref = None

    k = pl.program_id(1)
    nk = pl.num_programs(1)

    @pl.when(k == 0)
    def _():
        acc_ref[...] = jnp.zeros_like(acc_ref)

    # GEMM 1 chunk: native-dtype operands, f32 accumulation.
    h = jnp.dot(x_ref[...], w1_ref[...], preferred_element_type=jnp.float32)
    h = h + b1_ref[...].astype(jnp.float32)
    if activation == "gelu":
        h = _gelu_tanh(h)
    # GEMM 2 chunk: intermediate never leaves VMEM; accumulate in f32 scratch.
    acc_ref[...] += jnp.dot(h.astype(w2_ref.dtype), w2_ref[...],
                            preferred_element_type=jnp.float32)

    @pl.when(k == nk - 1)
    def _():
        res = res_ref[...] if residual_separate else x_ref[...]
        # Dropout: identity (inference mode).
        y = acc_ref[...] + b2_ref[...].astype(jnp.float32) + res.astype(jnp.float32)
        # LayerNorm over the last dim, single-pass statistics.
        mean = jnp.mean(y, axis=-1, keepdims=True)
        mean_sq = jnp.mean(y * y, axis=-1, keepdims=True)
        var = jnp.maximum(mean_sq - mean * mean, 0.0)
        inv = lax.rsqrt(var + eps)
        out = (y - mean) * inv * g_ref[...].astype(jnp.float32) \
            + beta_ref[...].astype(jnp.float32)
        o_ref[...] = out.astype(o_ref.dtype)


def fused_two_dense_ln(xp, resp, w1_t, b1, w2_t, b2, gamma, beta, *,
                       activation, tm, eps=LN_EPS):
    """LayerNorm( act(xp @ w1_t + b1) @ w2_t + b2 + residual ).
    xp (and resp) are row-padded to a multiple of tm. resp=None -> residual = xp."""
    m_pad, h_in = xp.shape
    h_mid = w1_t.shape[1]
    h_out = w2_t.shape[1]
    assert m_pad % tm == 0
    tk = _pick_tk(h_mid)
    nk = h_mid // tk

    residual_separate = resp is not None
    operands = [xp]
    in_specs = [pl.BlockSpec((tm, h_in), lambda i, k: (i, 0))]
    if residual_separate:
        operands.append(resp)
        in_specs.append(pl.BlockSpec((tm, h_out), lambda i, k: (i, 0)))
    operands += [w1_t, b1.reshape(1, h_mid), w2_t, b2.reshape(1, h_out),
                 gamma.reshape(1, h_out), beta.reshape(1, h_out)]
    in_specs += [
        pl.BlockSpec((h_in, tk), lambda i, k: (0, k)),       # W1 chunk (streamed)
        pl.BlockSpec((1, tk), lambda i, k: (0, k)),          # b1 chunk
        pl.BlockSpec((tk, h_out), lambda i, k: (k, 0)),      # W2 chunk (streamed)
        _resident_spec((1, h_out), lambda i, k: (0, 0)),     # b2
        _resident_spec((1, h_out), lambda i, k: (0, 0)),     # gamma
        _resident_spec((1, h_out), lambda i, k: (0, 0)),     # beta
    ]

    isz = jnp.dtype(xp.dtype).itemsize
    wsz = jnp.dtype(w1_t.dtype).itemsize
    needed = (2 * tm * (h_in + h_out + (h_out if residual_separate else 0)) * isz
              + 2 * (h_in * tk + tk * h_out + tk) * wsz     # weight/bias chunks
              + 6 * h_out * 4                               # b2, gamma, beta
              + tm * h_out * 4                              # acc scratch
              + tm * tk * 4                                 # live intermediate chunk
              + (4 << 20))

    kernel = functools.partial(_two_dense_ln_kernel, activation=activation,
                               residual_separate=residual_separate, eps=eps)
    return pl.pallas_call(
        kernel,
        out_shape=jax.ShapeDtypeStruct((m_pad, h_out), xp.dtype),
        grid_spec=pltpu.PrefetchScalarGridSpec(
            num_scalar_prefetch=0,
            grid=(m_pad // tm, nk),
            in_specs=in_specs,
            out_specs=pl.BlockSpec((tm, h_out), lambda i, k: (i, 0)),
            scratch_shapes=[pltpu.VMEM((tm, h_out), jnp.float32)],
        ),
        compiler_params=pltpu.CompilerParams(
            dimension_semantics=("parallel", "arbitrary"),
            vmem_limit_bytes=_vmem_limit(needed),
        ),
    )(*operands)


# ----------------------------------------------------------------------------
# Full BertLayer forward
# ----------------------------------------------------------------------------
_LINEAR_WEIGHTS = ("in_proj_w", "out_proj_w", "so_dense_w", "inter_w", "ffn_out_w")


def prepare_params(torch_layout_params, compute_dtype=None):
    """Transpose torch (out, in) Linear weights to (in, out) ONCE, outside the
    jit hot path.  Pass compute_dtype=jnp.bfloat16 on v6e/v7x to run matmuls
    on the bf16 MXU path (LN / softmax stay in f32)."""
    p = {k: jnp.asarray(v) for k, v in torch_layout_params.items()}
    for name in _LINEAR_WEIGHTS:
        w = p.pop(name).T
        if compute_dtype is not None:
            w = w.astype(compute_dtype)
        p[name + "_t"] = w
    return p


@functools.partial(jax.jit, static_argnames=("num_heads",))
def bert_layer_forward(x, seq_lengths, params, *, num_heads):
    """x: [B, S, H]; seq_lengths: [B] int32 (pad positions masked in attention)."""
    b, s, h = x.shape
    assert h % num_heads == 0
    m = b * s
    compute_dtype = params["in_proj_w_t"].dtype

    tm = _pick_tm(m, compute_dtype)
    m_pad = _round_up(m, tm)

    # Rows are padded ONCE here and sliced back ONCE at the end.
    x2p = _pad_rows(x.reshape(m, h).astype(compute_dtype), m_pad)

    # --- nn.MultiheadAttention (batch_first), inference ---
    qkv_p = fused_dense(x2p, params["in_proj_w_t"], params["in_proj_b"], tm=tm)  # [M_pad, 3H]
    qkv = qkv_p[:m].reshape(b, s, 3 * h)    # free reshape; no head transposes

    # key_padding_mask: True (pad) -> large negative additive bias.
    col = jnp.arange(s, dtype=jnp.int32)
    bias = jnp.where(col[None, :] < seq_lengths[:, None], 0.0, NEG_INF)
    bias = bias.astype(jnp.float32).reshape(b, 1, s)

    ctx = mha_attention(qkv, bias, num_heads=num_heads)       # [B, S, H], heads merged
    ctx2p = _pad_rows(ctx.reshape(m, h), m_pad)

    # --- out_proj + BertSelfOutput: LN(dense(out_proj(ctx)) + x) ---
    attn_out_p = fused_two_dense_ln(
        ctx2p, x2p,
        params["out_proj_w_t"], params["out_proj_b"],
        params["so_dense_w_t"], params["so_dense_b"],
        params["ln1_g"], params["ln1_b"],
        activation=None, tm=tm)

    # --- BertIntermediate + BertOutput: LN(dense(gelu(dense(a))) + a) ---
    out_p = fused_two_dense_ln(
        attn_out_p, None,
        params["inter_w_t"], params["inter_b"],
        params["ffn_out_w_t"], params["ffn_out_b"],
        params["ln2_g"], params["ln2_b"],
        activation="gelu", tm=tm)

    return out_p[:m].reshape(b, s, h).astype(x.dtype)


# ----------------------------------------------------------------------------
# Pure-JAX reference (same math, used only for the correctness assert)
# ----------------------------------------------------------------------------
def _layernorm_ref(y, g, b, eps=LN_EPS):
    mean = jnp.mean(y, axis=-1, keepdims=True)
    var = jnp.mean((y - mean) ** 2, axis=-1, keepdims=True)
    return (y - mean) * lax.rsqrt(var + eps) * g + b


def reference_bert_layer(x, seq_lengths, tp, num_heads):
    B, S, H = x.shape
    Dh = H // num_heads
    P = lax.Precision.HIGHEST

    qkv = jnp.einsum("bsh,oh->bso", x, tp["in_proj_w"], precision=P) + tp["in_proj_b"]
    q, k, v = qkv[..., :H], qkv[..., H:2 * H], qkv[..., 2 * H:]

    def split(t):
        return t.reshape(B, S, num_heads, Dh).transpose(0, 2, 1, 3)

    q, k, v = split(q), split(k), split(v)
    scores = jnp.einsum("bhqd,bhkd->bhqk", q, k, precision=P) * (1.0 / math.sqrt(Dh))
    valid = jnp.arange(S)[None, :] < seq_lengths[:, None]
    scores = jnp.where(valid[:, None, None, :], scores, NEG_INF)
    attn = jax.nn.softmax(scores, axis=-1)
    ctx = jnp.einsum("bhqk,bhkd->bhqd", attn, v, precision=P)
    ctx = ctx.transpose(0, 2, 1, 3).reshape(B, S, H)

    attn_proj = jnp.einsum("bsh,oh->bso", ctx, tp["out_proj_w"], precision=P) + tp["out_proj_b"]
    y = jnp.einsum("bsh,oh->bso", attn_proj, tp["so_dense_w"], precision=P) + tp["so_dense_b"]
    attention_output = _layernorm_ref(y + x, tp["ln1_g"], tp["ln1_b"])

    inter = _gelu_tanh(
        jnp.einsum("bsh,oh->bso", attention_output, tp["inter_w"], precision=P) + tp["inter_b"])
    z = jnp.einsum("bsh,oh->bso", inter, tp["ffn_out_w"], precision=P) + tp["ffn_out_b"]
    return _layernorm_ref(z + attention_output, tp["ln2_g"], tp["ln2_b"])


if __name__ == "__main__":
    B, S, H, NUM_HEADS = 2, 8, 32, 4
    key = jax.random.PRNGKey(0)
    keys = jax.random.split(key, 16)

    def make_linear(kw, kb, out_dim, in_dim):
        bound = 1.0 / math.sqrt(in_dim)
        w = jax.random.uniform(kw, (out_dim, in_dim), minval=-bound, maxval=bound,
                               dtype=jnp.float32)
        bb = jax.random.uniform(kb, (out_dim,), minval=-bound, maxval=bound,
                                dtype=jnp.float32)
        return w, bb

    in_proj_w, in_proj_b = make_linear(keys[0], keys[1], 3 * H, H)
    out_proj_w, out_proj_b = make_linear(keys[2], keys[3], H, H)
    so_dense_w, so_dense_b = make_linear(keys[4], keys[5], H, H)
    inter_w, inter_b = make_linear(keys[6], keys[7], H, H)
    ffn_out_w, ffn_out_b = make_linear(keys[8], keys[9], H, H)

    torch_params = dict(
        in_proj_w=in_proj_w, in_proj_b=in_proj_b,
        out_proj_w=out_proj_w, out_proj_b=out_proj_b,
        so_dense_w=so_dense_w, so_dense_b=so_dense_b,
        inter_w=inter_w, inter_b=inter_b,
        ffn_out_w=ffn_out_w, ffn_out_b=ffn_out_b,
        ln1_g=1.0 + 0.05 * jax.random.normal(keys[10], (H,), dtype=jnp.float32),
        ln1_b=0.05 * jax.random.normal(keys[11], (H,), dtype=jnp.float32),
        ln2_g=1.0 + 0.05 * jax.random.normal(keys[12], (H,), dtype=jnp.float32),
        ln2_b=0.05 * jax.random.normal(keys[13], (H,), dtype=jnp.float32),
    )
    # Weight transposes happen once, outside jit.  For bf16 MXU throughput on
    # v6e/v7x use: prepare_params(torch_params, compute_dtype=jnp.bfloat16)
    params = prepare_params(torch_params)

    x = jax.random.normal(keys[14], (B, S, H), dtype=jnp.float32)
    seq_lengths = jnp.array([8, 5], dtype=jnp.int32)

    out = bert_layer_forward(x, seq_lengths, params, num_heads=NUM_HEADS)
    out = jax.block_until_ready(out)

    ref = reference_bert_layer(x, seq_lengths, torch_params, NUM_HEADS)
    assert out.shape == (B, S, H)
    max_err = float(jnp.max(jnp.abs(out - ref)))
    assert jnp.allclose(out, ref, atol=5e-3, rtol=5e-3), (
        "mismatch vs reference: max abs err = %g" % max_err)

    print("KERNEL_OK")
</pallas_src>

<mosaic_0001>
module attributes {stable_mosaic.version = 11 : i64} {
  func.func @_dense_kernel(%arg0: i32, %arg1: memref<16x32xf32, #tpu.memory_space<vmem>>, %arg2: memref<32x96xf32, #tpu.memory_space<vmem>>, %arg3: memref<1x96xf32, #tpu.memory_space<vmem>>, %arg4: memref<16x96xf32, #tpu.memory_space<vmem>>) attributes {dimension_semantics = [#tpu.dimension_semantics<parallel>], iteration_bounds = array<i64: 1>, scalar_prefetch = 0 : i64, scratch_operands = 0 : i64, tpu.core_type = #tpu.core_type<tc>, window_params = [{transform_indices = @transform_0, window_bounds = array<i64: 16, 32>}, {pipeline_mode = #tpu.pipeline_mode<synchronous>, transform_indices = @transform_1, window_bounds = array<i64: 32, 96>}, {pipeline_mode = #tpu.pipeline_mode<synchronous>, transform_indices = @transform_2, window_bounds = array<i64: 1, 96>}, {transform_indices = @transform_3, window_bounds = array<i64: 16, 96>}]} {
    %c0 = arith.constant 0 : index
    %c0_0 = arith.constant 0 : index
    %0 = vector.load %arg1[%c0, %c0_0] : memref<16x32xf32, #tpu.memory_space<vmem>>, vector<16x32xf32>
    %c0_1 = arith.constant 0 : index
    %c0_2 = arith.constant 0 : index
    %1 = vector.load %arg2[%c0_1, %c0_2] : memref<32x96xf32, #tpu.memory_space<vmem>>, vector<32x96xf32>
    %cst = arith.constant dense<0.000000e+00> : vector<16x96xf32>
    %2 = tpu.matmul %0, %1, %cst {dimension_numbers = #tpu.dot_dimension_numbers<[1], [0], [0], [1], [0, 0, 1, 1], [], []>} : vector<16x32xf32>, vector<32x96xf32>, vector<16x96xf32> -> vector<16x96xf32>
    %c0_3 = arith.constant 0 : index
    %c0_4 = arith.constant 0 : index
    %3 = vector.load %arg3[%c0_3, %c0_4] : memref<1x96xf32, #tpu.memory_space<vmem>>, vector<1x96xf32>
    %4 = vector.broadcast %3 : vector<1x96xf32> to vector<16x96xf32>
    %5 = arith.addf %2, %4 : vector<16x96xf32>
    %c0_5 = arith.constant 0 : index
    %c0_6 = arith.constant 0 : index
    %6 = vector.load %arg4[%c0_5, %c0_6] : memref<16x96xf32, #tpu.memory_space<vmem>>, vector<16x96xf32>
    tpu.vector_store %arg4[%c0_5, %c0_6], %5 {strides = array<i32>} : memref<16x96xf32, #tpu.memory_space<vmem>>, vector<16x96xf32>,
    return
  }
  func.func @transform_0(%arg0: i32) -> (i32, i32) {
    %c0_i32 = arith.constant 0 : i32
    %c0_i32_0 = arith.constant 0 : i32
    return %arg0, %c0_i32 : i32, i32
  }
  func.func @transform_1(%arg0: i32) -> (i32, i32) {
    %c0_i32 = arith.constant 0 : i32
    %c0_i32_0 = arith.constant 0 : i32
    %c0_i32_1 = arith.constant 0 : i32
    return %c0_i32, %c0_i32_0 : i32, i32
  }
  func.func @transform_2(%arg0: i32) -> (i32, i32) {
    %c0_i32 = arith.constant 0 : i32
    %c0_i32_0 = arith.constant 0 : i32
    %c0_i32_1 = arith.constant 0 : i32
    return %c0_i32, %c0_i32_0 : i32, i32
  }
  func.func @transform_3(%arg0: i32) -> (i32, i32) {
    %c0_i32 = arith.constant 0 : i32
    %c0_i32_0 = arith.constant 0 : i32
    return %arg0, %c0_i32 : i32, i32
  }
}

module attributes {stable_mosaic.version = 11 : i64} {
  func.func @_two_dense_ln_kernel(%arg0: i32, %arg1: i32, %arg2: memref<16x32xf32, #tpu.memory_space<vmem>>, %arg3: memref<16x32xf32, #tpu.memory_space<vmem>>, %arg4: memref<32x32xf32, #tpu.memory_space<vmem>>, %arg5: memref<1x32xf32, #tpu.memory_space<vmem>>, %arg6: memref<32x32xf32, #tpu.memory_space<vmem>>, %arg7: memref<1x32xf32, #tpu.memory_space<vmem>>, %arg8: memref<1x32xf32, #tpu.memory_space<vmem>>, %arg9: memref<1x32xf32, #tpu.memory_space<vmem>>, %arg10: memref<16x32xf32, #tpu.memory_space<vmem>>, %arg11: memref<16x32xf32, #tpu.memory_space<vmem>>) attributes {dimension_semantics = [#tpu.dimension_semantics<parallel>, #tpu.dimension_semantics<arbitrary>], iteration_bounds = array<i64: 1, 1>, scalar_prefetch = 0 : i64, scratch_operands = 1 : i64, tpu.core_type = #tpu.core_type<tc>, window_params = [{transform_indices = @transform_0, window_bounds = array<i64: 16, 32>}, {transform_indices = @transform_1, window_bounds = array<i64: 16, 32>}, {transform_indices = @transform_2, window_bounds = array<i64: 32, 32>}, {transform_indices = @transform_3, window_bounds = array<i64: 1, 32>}, {transform_indices = @transform_4, window_bounds = array<i64: 32, 32>}, {pipeline_mode = #tpu.pipeline_mode<synchronous>, transform_indices = @transform_5, window_bounds = array<i64: 1, 32>}, {pipeline_mode = #tpu.pipeline_mode<synchronous>, transform_indices = @transform_6, window_bounds = array<i64: 1, 32>}, {pipeline_mode = #tpu.pipeline_mode<synchronous>, transform_indices = @transform_7, window_bounds = array<i64: 1, 32>}, {transform_indices = @transform_8, window_bounds = array<i64: 16, 32>}]} {
    %c0_i32 = arith.constant 0 : i32
    %0 = arith.cmpi eq, %arg1, %c0_i32 : i32
    %1 = arith.extui %0 : i1 to i32
    %c0_i32_0 = arith.constant 0 : i32
    %2 = arith.cmpi ne, %1, %c0_i32_0 : i32
    scf.if %2 {
      %cst_15 = arith.constant 0.000000e+00 : f32
      %17 = vector.broadcast %cst_15 : f32 to vector<16x32xf32>
      %c0_16 = arith.constant 0 : index
      %c0_17 = arith.constant 0 : index
      %18 = vector.load %arg11[%c0_16, %c0_17] : memref<16x32xf32, #tpu.memory_space<vmem>>, vector<16x32xf32>
      tpu.vector_store %arg11[%c0_16, %c0_17], %17 {strides = array<i32>} : memref<16x32xf32, #tpu.memory_space<vmem>>, vector<16x32xf32>,
    } else {
    }
    %c0 = arith.constant 0 : index
    %c0_1 = arith.constant 0 : index
    %3 = vector.load %arg2[%c0, %c0_1] : memref<16x32xf32, #tpu.memory_space<vmem>>, vector<16x32xf32>
    %c0_2 = arith.constant 0 : index
    %c0_3 = arith.constant 0 : index
    %4 = vector.load %arg4[%c0_2, %c0_3] : memref<32x32xf32, #tpu.memory_space<vmem>>, vector<32x32xf32>
    %cst = arith.constant dense<0.000000e+00> : vector<16x32xf32>
    %5 = tpu.matmul %3, %4, %cst {dimension_numbers = #tpu.dot_dimension_numbers<[1], [0], [0], [1], [0, 0, 1, 1], [], []>} : vector<16x32xf32>, vector<32x32xf32>, vector<16x32xf32> -> vector<16x32xf32>
    %c0_4 = arith.constant 0 : index
    %c0_5 = arith.constant 0 : index
    %6 = vector.load %arg5[%c0_4, %c0_5] : memref<1x32xf32, #tpu.memory_space<vmem>>, vector<1x32xf32>
    %7 = vector.broadcast %6 : vector<1x32xf32> to vector<16x32xf32>
    %8 = arith.addf %5, %7 : vector<16x32xf32>
    %c0_6 = arith.constant 0 : index
    %c0_7 = arith.constant 0 : index
    %9 = vector.load %arg11[%c0_6, %c0_7] : memref<16x32xf32, #tpu.memory_space<vmem>>, vector<16x32xf32>
    %c0_8 = arith.constant 0 : index
    %c0_9 = arith.constant 0 : index
    %10 = vector.load %arg6[%c0_8, %c0_9] : memref<32x32xf32, #tpu.memory_space<vmem>>, vector<32x32xf32>
    %cst_10 = arith.constant dense<0.000000e+00> : vector<16x32xf32>
    %11 = tpu.matmul %8, %10, %cst_10 {dimension_numbers = #tpu.dot_dimension_numbers<[1], [0], [0], [1], [0, 0, 1, 1], [], []>} : vector<16x32xf32>, vector<32x32xf32>, vector<16x32xf32> -> vector<16x32xf32>
    %12 = arith.addf %9, %11 : vector<16x32xf32>
    %c0_11 = arith.constant 0 : index
    %c0_12 = arith.constant 0 : index
    %13 = vector.load %arg11[%c0_11, %c0_12] : memref<16x32xf32, #tpu.memory_space<vmem>>, vector<16x32xf32>
    tpu.vector_store %arg11[%c0_11, %c0_12], %12 {strides = array<i32>} : memref<16x32xf32, #tpu.memory_space<vmem>>, vector<16x32xf32>,
    %c0_i32_13 = arith.constant 0 : i32
    %14 = arith.cmpi eq, %arg1, %c0_i32_13 : i32
    %15 = arith.extui %14 : i1 to i32
    %c0_i32_14 = arith.constant 0 : i32
    %16 = arith.cmpi ne, %15, %c0_i32_14 : i32
    scf.if %16 {
      %c0_15 = arith.constant 0 : index
      %c0_16 = arith.constant 0 : index
      %17 = vector.load %arg3[%c0_15, %c0_16] : memref<16x32xf32, #tpu.memory_space<vmem>>, vector<16x32xf32>
      %c0_17 = arith.constant 0 : index
      %c0_18 = arith.constant 0 : index
      %18 = vector.load %arg11[%c0_17, %c0_18] : memref<16x32xf32, #tpu.memory_space<vmem>>, vector<16x32xf32>
      %c0_19 = arith.constant 0 : index
      %c0_20 = arith.constant 0 : index
      %19 = vector.load %arg7[%c0_19, %c0_20] : memref<1x32xf32, #tpu.memory_space<vmem>>, vector<1x32xf32>
      %20 = vector.broadcast %19 : vector<1x32xf32> to vector<16x32xf32>
      %21 = arith.addf %18, %20 : vector<16x32xf32>
      %22 = arith.addf %21, %17 : vector<16x32xf32>
      %cst_21 = arith.constant dense<0.000000e+00> : vector<16xf32>
      %23 = vector.multi_reduction <add>, %22, %cst_21 [1] : vector<16x32xf32> to vector<16xf32>
      %24 = vector.shape_cast %23 : vector<16xf32> to vector<16x1xf32>
      %cst_22 = arith.constant 3.200000e+01 : f32
      %25 = vector.broadcast %cst_22 : f32 to vector<16x1xf32>
      %26 = arith.divf %24, %25 : vector<16x1xf32>
      %27 = arith.mulf %22, %22 : vector<16x32xf32>
      %cst_23 = arith.constant dense<0.000000e+00> : vector<16xf32>
      %28 = vector.multi_reduction <add>, %27, %cst_23 [1] : vector<16x32xf32> to vector<16xf32>
      %29 = vector.shape_cast %28 : vector<16xf32> to vector<16x1xf32>
      %cst_24 = arith.constant 3.200000e+01 : f32
      %30 = vector.broadcast %cst_24 : f32 to vector<16x1xf32>
      %31 = arith.divf %29, %30 : vector<16x1xf32>
      %32 = arith.mulf %26, %26 : vector<16x1xf32>
      %33 = arith.subf %31, %32 : vector<16x1xf32>
      %cst_25 = arith.constant 0.000000e+00 : f32
      %34 = vector.broadcast %cst_25 : f32 to vector<16x1xf32>
      %35 = arith.maximumf %33, %34 : vector<16x1xf32>
      %cst_26 = arith.constant 9.99999974E-6 : f32
      %36 = vector.broadcast %cst_26 : f32 to vector<16x1xf32>
      %37 = arith.addf %35, %36 : vector<16x1xf32>
      %38 = math.rsqrt %37 : vector<16x1xf32>
      %39 = vector.broadcast %26 : vector<16x1xf32> to vector<16x32xf32>
      %40 = arith.subf %22, %39 : vector<16x32xf32>
      %41 = vector.broadcast %38 : vector<16x1xf32> to vector<16x32xf32>
      %42 = arith.mulf %40, %41 : vector<16x32xf32>
      %c0_27 = arith.constant 0 : index
      %c0_28 = arith.constant 0 : index
      %43 = vector.load %arg8[%c0_27, %c0_28] : memref<1x32xf32, #tpu.memory_space<vmem>>, vector<1x32xf32>
      %44 = vector.broadcast %43 : vector<1x32xf32> to vector<16x32xf32>
      %45 = arith.mulf %42, %44 : vector<16x32xf32>
      %c0_29 = arith.constant 0 : index
      %c0_30 = arith.constant 0 : index
      %46 = vector.load %arg9[%c0_29, %c0_30] : memref<1x32xf32, #tpu.memory_space<vmem>>, vector<1x32xf32>
      %47 = vector.broadcast %46 : vector<1x32xf32> to vector<16x32xf32>
      %48 = arith.addf %45, %47 : vector<16x32xf32>
      %c0_31 = arith.constant 0 : index
      %c0_32 = arith.constant 0 : index
      %49 = vector.load %arg10[%c0_31, %c0_32] : memref<16x32xf32, #tpu.memory_space<vmem>>, vector<16x32xf32>
      tpu.vector_store %arg10[%c0_31, %c0_32], %48 {strides = array<i32>} : memref<16x32xf32, #tpu.memory_space<vmem>>, vector<16x32xf32>,
    } else {
    }
    return
  }
  func.func @transform_0(%arg0: i32, %arg1: i32) -> (i32, i32) {
    %c0_i32 = arith.constant 0 : i32
    %c0_i32_0 = arith.constant 0 : i32
    return %arg0, %c0_i32 : i32, i32
  }
  func.func @transform_1(%arg0: i32, %arg1: i32) -> (i32, i32) {
    %c0_i32 = arith.constant 0 : i32
    %c0_i32_0 = arith.constant 0 : i32
    return %arg0, %c0_i32 : i32, i32
  }
  func.func @transform_2(%arg0: i32, %arg1: i32) -> (i32, i32) {
    %c0_i32 = arith.constant 0 : i32
    %c0_i32_0 = arith.constant 0 : i32
    return %c0_i32, %arg1 : i32, i32
  }
  func.func @transform_3(%arg0: i32, %arg1: i32) -> (i32, i32) {
    %c0_i32 = arith.constant 0 : i32
    %c0_i32_0 = arith.constant 0 : i32
    return %c0_i32, %arg1 : i32, i32
  }
  func.func @transform_4(%arg0: i32, %arg1: i32) -> (i32, i32) {
    %c0_i32 = arith.constant 0 : i32
    %c0_i32_0 = arith.constant 0 : i32
    return %arg1, %c0_i32 : i32, i32
  }
  func.func @transform_5(%arg0: i32, %arg1: i32) -> (i32, i32) {
    %c0_i32 = arith.constant 0 : i32
    %c0_i32_0 = arith.constant 0 : i32
    %c0_i32_1 = arith.constant 0 : i32
    return %c0_i32, %c0_i32_0 : i32, i32
  }
  func.func @transform_6(%arg0: i32, %arg1: i32) -> (i32, i32) {
    %c0_i32 = arith.constant 0 : i32
    %c0_i32_0 = arith.constant 0 : i32
    %c0_i32_1 = arith.constant 0 : i32
    return %c0_i32, %c0_i32_0 : i32, i32
  }
  func.func @transform_7(%arg0: i32, %arg1: i32) -> (i32, i32) {
    %c0_i32 = arith.constant 0 : i32
    %c0_i32_0 = arith.constant 0 : i32
    %c0_i32_1 = arith.constant 0 : i32
    return %c0_i32, %c0_i32_0 : i32, i32
  }
  func.func @transform_8(%arg0: i32, %arg1: i32) -> (i32, i32) {
    %c0_i32 = arith.constant 0 : i32
    %c0_i32_0 = arith.constant 0 : i32
    return %arg0, %c0_i32 : i32, i32
  }
}

module attributes {stable_mosaic.version = 11 : i64} {
  func.func @_attention_kernel(%arg0: i32, %arg1: memref<1x8x96xf32, #tpu.memory_space<vmem>>, %arg2: memref<1x1x8xf32, #tpu.memory_space<vmem>>, %arg3: memref<1x8x32xf32, #tpu.memory_space<vmem>>) attributes {dimension_semantics = [#tpu.dimension_semantics<parallel>], iteration_bounds = array<i64: 2>, scalar_prefetch = 0 : i64, scratch_operands = 0 : i64, tpu.core_type = #tpu.core_type<tc>, window_params = [{transform_indices = @transform_0, window_bounds = array<i64: 1, 8, 96>}, {transform_indices = @transform_1, window_bounds = array<i64: 1, 1, 8>}, {transform_indices = @transform_2, window_bounds = array<i64: 1, 8, 32>}]} {
    %c0 = arith.constant 0 : index
    %c0_0 = arith.constant 0 : index
    %c0_1 = arith.constant 0 : index
    %0 = vector.load %arg1[%c0, %c0_0, %c0_1] : memref<1x8x96xf32, #tpu.memory_space<vmem>>, vector<1x8x96xf32>
    %1 = vector.shape_cast %0 : vector<1x8x96xf32> to vector<8x96xf32>
    %c0_2 = arith.constant 0 : index
    %c0_3 = arith.constant 0 : index
    %c0_4 = arith.constant 0 : index
    %2 = vector.load %arg2[%c0_2, %c0_3, %c0_4] : memref<1x1x8xf32, #tpu.memory_space<vmem>>, vector<1x1x8xf32>
    %3 = vector.shape_cast %2 : vector<1x1x8xf32> to vector<1x8xf32>
    %4 = vector.extract_strided_slice %1 {offsets = [0, 0], sizes = [8, 8], strides = [1, 1]} : vector<8x96xf32> to vector<8x8xf32>
    %5 = vector.extract_strided_slice %1 {offsets = [0, 32], sizes = [8, 8], strides = [1, 1]} : vector<8x96xf32> to vector<8x8xf32>
    %6 = vector.extract_strided_slice %1 {offsets = [0, 64], sizes = [8, 8], strides = [1, 1]} : vector<8x96xf32> to vector<8x8xf32>
    %cst = arith.constant dense<0.000000e+00> : vector<8x8xf32>
    %7 = tpu.matmul %4, %5, %cst {dimension_numbers = #tpu.dot_dimension_numbers<[1], [1], [0], [0], [0, 0, 1, 0], [], []>} : vector<8x8xf32>, vector<8x8xf32>, vector<8x8xf32> -> vector<8x8xf32>
    %cst_5 = arith.constant 0.353553385 : f32
    %8 = vector.broadcast %cst_5 : f32 to vector<8x8xf32>
    %9 = arith.mulf %7, %8 : vector<8x8xf32>
    %10 = vector.broadcast %3 : vector<1x8xf32> to vector<8x8xf32>
    %11 = arith.addf %9, %10 : vector<8x8xf32>
    %cst_6 = arith.constant dense<0xFF800000> : vector<8xf32>
    %12 = vector.multi_reduction <maximumf>, %11, %cst_6 [1] : vector<8x8xf32> to vector<8xf32>
    %13 = vector.shape_cast %12 : vector<8xf32> to vector<8x1xf32>
    %14 = vector.broadcast %13 : vector<8x1xf32> to vector<8x8xf32>
    %15 = arith.subf %11, %14 : vector<8x8xf32>
    %16 = math.exp %15 : vector<8x8xf32>
    %cst_7 = arith.constant dense<0.000000e+00> : vector<8xf32>
    %17 = vector.multi_reduction <add>, %16, %cst_7 [1] : vector<8x8xf32> to vector<8xf32>
    %18 = vector.shape_cast %17 : vector<8xf32> to vector<8x1xf32>
    %19 = tpu.reciprocal %18 {approx = true} : vector<8x1xf32> -> vector<8x1xf32>
    %20 = vector.broadcast %19 : vector<8x1xf32> to vector<8x8xf32>
    %21 = arith.mulf %16, %20 : vector<8x8xf32>
    %cst_8 = arith.constant dense<0.000000e+00> : vector<8x8xf32>
    %22 = tpu.matmul %21, %6, %cst_8 {dimension_numbers = #tpu.dot_dimension_numbers<[1], [0], [0], [1], [0, 0, 1, 1], [], []>} : vector<8x8xf32>, vector<8x8xf32>, vector<8x8xf32> -> vector<8x8xf32>
    %23 = vector.extract_strided_slice %1 {offsets = [0, 8], sizes = [8, 8], strides = [1, 1]} : vector<8x96xf32> to vector<8x8xf32>
    %24 = vector.extract_strided_slice %1 {offsets = [0, 40], sizes = [8, 8], strides = [1, 1]} : vector<8x96xf32> to vector<8x8xf32>
    %25 = vector.extract_strided_slice %1 {offsets = [0, 72], sizes = [8, 8], strides = [1, 1]} : vector<8x96xf32> to vector<8x8xf32>
    %cst_9 = arith.constant dense<0.000000e+00> : vector<8x8xf32>
    %26 = tpu.matmul %23, %24, %cst_9 {dimension_numbers = #tpu.dot_dimension_numbers<[1], [1], [0], [0], [0, 0, 1, 0], [], []>} : vector<8x8xf32>, vector<8x8xf32>, vector<8x8xf32> -> vector<8x8xf32>
    %cst_10 = arith.constant 0.353553385 : f32
    %27 = vector.broadcast %cst_10 : f32 to vector<8x8xf32>
    %28 = arith.mulf %26, %27 : vector<8x8xf32>
    %29 = vector.broadcast %3 : vector<1x8xf32> to vector<8x8xf32>
    %30 = arith.addf %28, %29 : vector<8x8xf32>
    %cst_11 = arith.constant dense<0xFF800000> : vector<8xf32>
    %31 = vector.multi_reduction <maximumf>, %30, %cst_11 [1] : vector<8x8xf32> to vector<8xf32>
    %32 = vector.shape_cast %31 : vector<8xf32> to vector<8x1xf32>
    %33 = vector.broadcast %32 : vector<8x1xf32> to vector<8x8xf32>
    %34 = arith.subf %30, %33 : vector<8x8xf32>
    %35 = math.exp %34 : vector<8x8xf32>
    %cst_12 = arith.constant dense<0.000000e+00> : vector<8xf32>
    %36 = vector.multi_reduction <add>, %35, %cst_12 [1] : vector<8x8xf32> to vector<8xf32>
    %37 = vector.shape_cast %36 : vector<8xf32> to vector<8x1xf32>
    %38 = tpu.reciprocal %37 {approx = true} : vector<8x1xf32> -> vector<8x1xf32>
    %39 = vector.broadcast %38 : vector<8x1xf32> to vector<8x8xf32>
    %40 = arith.mulf %35, %39 : vector<8x8xf32>
    %cst_13 = arith.constant dense<0.000000e+00> : vector<8x8xf32>
    %41 = tpu.matmul %40, %25, %cst_13 {dimension_numbers = #tpu.dot_dimension_numbers<[1], [0], [0], [1], [0, 0, 1, 1], [], []>} : vector<8x8xf32>, vector<8x8xf32>, vector<8x8xf32> -> vector<8x8xf32>
    %42 = vector.extract_strided_slice %1 {offsets = [0, 16], sizes = [8, 8], strides = [1, 1]} : vector<8x96xf32> to vector<8x8xf32>
    %43 = vector.extract_strided_slice %1 {offsets = [0, 48], sizes = [8, 8], strides = [1, 1]} : vector<8x96xf32> to vector<8x8xf32>
    %44 = vector.extract_strided_slice %1 {offsets = [0, 80], sizes = [8, 8], strides = [1, 1]} : vector<8x96xf32> to vector<8x8xf32>
    %cst_14 = arith.constant dense<0.000000e+00> : vector<8x8xf32>
    %45 = tpu.matmul %42, %43, %cst_14 {dimension_numbers = #tpu.dot_dimension_numbers<[1], [1], [0], [0], [0, 0, 1, 0], [], []>} : vector<8x8xf32>, vector<8x8xf32>, vector<8x8xf32> -> vector<8x8xf32>
    %cst_15 = arith.constant 0.353553385 : f32
    %46 = vector.broadcast %cst_15 : f32 to vector<8x8xf32>
    %47 = arith.mulf %45, %46 : vector<8x8xf32>
    %48 = vector.broadcast %3 : vector<1x8xf32> to vector<8x8xf32>
    %49 = arith.addf %47, %48 : vector<8x8xf32>
    %cst_16 = arith.constant dense<0xFF800000> : vector<8xf32>
    %50 = vector.multi_reduction <maximumf>, %49, %cst_16 [1] : vector<8x8xf32> to vector<8xf32>
    %51 = vector.shape_cast %50 : vector<8xf32> to vector<8x1xf32>
    %52 = vector.broadcast %51 : vector<8x1xf32> to vector<8x8xf32>
    %53 = arith.subf %49, %52 : vector<8x8xf32>
    %54 = math.exp %53 : vector<8x8xf32>
    %cst_17 = arith.constant dense<0.000000e+00> : vector<8xf32>
    %55 = vector.multi_reduction <add>, %54, %cst_17 [1] : vector<8x8xf32> to vector<8xf32>
    %56 = vector.shape_cast %55 : vector<8xf32> to vector<8x1xf32>
    %57 = tpu.reciprocal %56 {approx = true} : vector<8x1xf32> -> vector<8x1xf32>
    %58 = vector.broadcast %57 : vector<8x1xf32> to vector<8x8xf32>
    %59 = arith.mulf %54, %58 : vector<8x8xf32>
    %cst_18 = arith.constant dense<0.000000e+00> : vector<8x8xf32>
    %60 = tpu.matmul %59, %44, %cst_18 {dimension_numbers = #tpu.dot_dimension_numbers<[1], [0], [0], [1], [0, 0, 1, 1], [], []>} : vector<8x8xf32>, vector<8x8xf32>, vector<8x8xf32> -> vector<8x8xf32>
    %61 = vector.extract_strided_slice %1 {offsets = [0, 24], sizes = [8, 8], strides = [1, 1]} : vector<8x96xf32> to vector<8x8xf32>
    %62 = vector.extract_strided_slice %1 {offsets = [0, 56], sizes = [8, 8], strides = [1, 1]} : vector<8x96xf32> to vector<8x8xf32>
    %63 = vector.extract_strided_slice %1 {offsets = [0, 88], sizes = [8, 8], strides = [1, 1]} : vector<8x96xf32> to vector<8x8xf32>
    %cst_19 = arith.constant dense<0.000000e+00> : vector<8x8xf32>
    %64 = tpu.matmul %61, %62, %cst_19 {dimension_numbers = #tpu.dot_dimension_numbers<[1], [1], [0], [0], [0, 0, 1, 0], [], []>} : vector<8x8xf32>, vector<8x8xf32>, vector<8x8xf32> -> vector<8x8xf32>
    %cst_20 = arith.constant 0.353553385 : f32
    %65 = vector.broadcast %cst_20 : f32 to vector<8x8xf32>
    %66 = arith.mulf %64, %65 : vector<8x8xf32>
    %67 = vector.broadcast %3 : vector<1x8xf32> to vector<8x8xf32>
    %68 = arith.addf %66, %67 : vector<8x8xf32>
    %cst_21 = arith.constant dense<0xFF800000> : vector<8xf32>
    %69 = vector.multi_reduction <maximumf>, %68, %cst_21 [1] : vector<8x8xf32> to vector<8xf32>
    %70 = vector.shape_cast %69 : vector<8xf32> to vector<8x1xf32>
    %71 = vector.broadcast %70 : vector<8x1xf32> to vector<8x8xf32>
    %72 = arith.subf %68, %71 : vector<8x8xf32>
    %73 = math.exp %72 : vector<8x8xf32>
    %cst_22 = arith.constant dense<0.000000e+00> : vector<8xf32>
    %74 = vector.multi_reduction <add>, %73, %cst_22 [1] : vector<8x8xf32> to vector<8xf32>
    %75 = vector.shape_cast %74 : vector<8xf32> to vector<8x1xf32>
    %76 = tpu.reciprocal %75 {approx = true} : vector<8x1xf32> -> vector<8x1xf32>
    %77 = vector.broadcast %76 : vector<8x1xf32> to vector<8x8xf32>
    %78 = arith.mulf %73, %77 : vector<8x8xf32>
    %cst_23 = arith.constant dense<0.000000e+00> : vector<8x8xf32>
    %79 = tpu.matmul %78, %63, %cst_23 {dimension_numbers = #tpu.dot_dimension_numbers<[1], [0], [0], [1], [0, 0, 1, 1], [], []>} : vector<8x8xf32>, vector<8x8xf32>, vector<8x8xf32> -> vector<8x8xf32>
    %80 = tpu.concatenate %22, %41, %60, %79 in 1 : vector<8x8xf32>, vector<8x8xf32>, vector<8x8xf32>, vector<8x8xf32> -> vector<8x32xf32>
    %c0_24 = arith.constant 0 : index
    %c0_25 = arith.constant 0 : index
    %c0_26 = arith.constant 0 : index
    %81 = vector.load %arg3[%c0_24, %c0_25, %c0_26] : memref<1x8x32xf32, #tpu.memory_space<vmem>>, vector<1x8x32xf32>
    %82 = vector.shape_cast %81 : vector<1x8x32xf32> to vector<8x32xf32>
    %83 = vector.shape_cast %80 : vector<8x32xf32> to vector<1x8x32xf32>
    tpu.vector_store %arg3[%c0_24, %c0_25, %c0_26], %83 {strides = array<i32>} : memref<1x8x32xf32, #tpu.memory_space<vmem>>, vector<1x8x32xf32>,
    return
  }
  func.func @transform_0(%arg0: i32) -> (i32, i32, i32) {
    %c0_i32 = arith.constant 0 : i32
    %c0_i32_0 = arith.constant 0 : i32
    %c0_i32_1 = arith.constant 0 : i32
    return %arg0, %c0_i32, %c0_i32_0 : i32, i32, i32
  }
  func.func @transform_1(%arg0: i32) -> (i32, i32, i32) {
    %c0_i32 = arith.constant 0 : i32
    %c0_i32_0 = arith.constant 0 : i32
    %c0_i32_1 = arith.constant 0 : i32
    return %arg0, %c0_i32, %c0_i32_0 : i32, i32, i32
  }
  func.func @transform_2(%arg0: i32) -> (i32, i32, i32) {
    %c0_i32 = arith.constant 0 : i32
    %c0_i32_0 = arith.constant 0 : i32
    %c0_i32_1 = arith.constant 0 : i32
    return %arg0, %c0_i32, %c0_i32_0 : i32, i32, i32
  }
}

module attributes {stable_mosaic.version = 11 : i64} {
  func.func @_two_dense_ln_kernel(%arg0: i32, %arg1: i32, %arg2: memref<16x32xf32, #tpu.memory_space<vmem>>, %arg3: memref<32x32xf32, #tpu.memory_space<vmem>>, %arg4: memref<1x32xf32, #tpu.memory_space<vmem>>, %arg5: memref<32x32xf32, #tpu.memory_space<vmem>>, %arg6: memref<1x32xf32, #tpu.memory_space<vmem>>, %arg7: memref<1x32xf32, #tpu.memory_space<vmem>>, %arg8: memref<1x32xf32, #tpu.memory_space<vmem>>, %arg9: memref<16x32xf32, #tpu.memory_space<vmem>>, %arg10: memref<16x32xf32, #tpu.memory_space<vmem>>) attributes {dimension_semantics = [#tpu.dimension_semantics<parallel>, #tpu.dimension_semantics<arbitrary>], iteration_bounds = array<i64: 1, 1>, scalar_prefetch = 0 : i64, scratch_operands = 1 : i64, tpu.core_type = #tpu.core_type<tc>, window_params = [{transform_indices = @transform_0, window_bounds = array<i64: 16, 32>}, {transform_indices = @transform_1, window_bounds = array<i64: 32, 32>}, {transform_indices = @transform_2, window_bounds = array<i64: 1, 32>}, {transform_indices = @transform_3, window_bounds = array<i64: 32, 32>}, {pipeline_mode = #tpu.pipeline_mode<synchronous>, transform_indices = @transform_4, window_bounds = array<i64: 1, 32>}, {pipeline_mode = #tpu.pipeline_mode<synchronous>, transform_indices = @transform_5, window_bounds = array<i64: 1, 32>}, {pipeline_mode = #tpu.pipeline_mode<synchronous>, transform_indices = @transform_6, window_bounds = array<i64: 1, 32>}, {transform_indices = @transform_7, window_bounds = array<i64: 16, 32>}]} {
    %c0_i32 = arith.constant 0 : i32
    %0 = arith.cmpi eq, %arg1, %c0_i32 : i32
    %1 = arith.extui %0 : i1 to i32
    %c0_i32_0 = arith.constant 0 : i32
    %2 = arith.cmpi ne, %1, %c0_i32_0 : i32
    scf.if %2 {
      %cst_19 = arith.constant 0.000000e+00 : f32
      %30 = vector.broadcast %cst_19 : f32 to vector<16x32xf32>
      %c0_20 = arith.constant 0 : index
      %c0_21 = arith.constant 0 : index
      %31 = vector.load %arg10[%c0_20, %c0_21] : memref<16x32xf32, #tpu.memory_space<vmem>>, vector<16x32xf32>
      tpu.vector_store %arg10[%c0_20, %c0_21], %30 {strides = array<i32>} : memref<16x32xf32, #tpu.memory_space<vmem>>, vector<16x32xf32>,
    } else {
    }
    %c0 = arith.constant 0 : index
    %c0_1 = arith.constant 0 : index
    %3 = vector.load %arg2[%c0, %c0_1] : memref<16x32xf32, #tpu.memory_space<vmem>>, vector<16x32xf32>
    %c0_2 = arith.constant 0 : index
    %c0_3 = arith.constant 0 : index
    %4 = vector.load %arg3[%c0_2, %c0_3] : memref<32x32xf32, #tpu.memory_space<vmem>>, vector<32x32xf32>
    %cst = arith.constant dense<0.000000e+00> : vector<16x32xf32>
    %5 = tpu.matmul %3, %4, %cst {dimension_numbers = #tpu.dot_dimension_numbers<[1], [0], [0], [1], [0, 0, 1, 1], [], []>} : vector<16x32xf32>, vector<32x32xf32>, vector<16x32xf32> -> vector<16x32xf32>
    %c0_4 = arith.constant 0 : index
    %c0_5 = arith.constant 0 : index
    %6 = vector.load %arg4[%c0_4, %c0_5] : memref<1x32xf32, #tpu.memory_space<vmem>>, vector<1x32xf32>
    %7 = vector.broadcast %6 : vector<1x32xf32> to vector<16x32xf32>
    %8 = arith.addf %5, %7 : vector<16x32xf32>
    %cst_6 = arith.constant 5.000000e-01 : f32
    %9 = vector.broadcast %cst_6 : f32 to vector<16x32xf32>
    %10 = arith.mulf %9, %8 : vector<16x32xf32>
    %cst_7 = arith.constant 4.471500e-02 : f32
    %11 = vector.broadcast %cst_7 : f32 to vector<16x32xf32>
    %12 = arith.mulf %11, %8 : vector<16x32xf32>
    %13 = arith.mulf %12, %8 : vector<16x32xf32>
    %14 = arith.mulf %13, %8 : vector<16x32xf32>
    %15 = arith.addf %8, %14 : vector<16x32xf32>
    %cst_8 = arith.constant 0.797884583 : f32
    %16 = vector.broadcast %cst_8 : f32 to vector<16x32xf32>
    %17 = arith.mulf %16, %15 : vector<16x32xf32>
    %18 = math.tanh %17 : vector<16x32xf32>
    %cst_9 = arith.constant 1.000000e+00 : f32
    %19 = vector.broadcast %cst_9 : f32 to vector<16x32xf32>
    %20 = arith.addf %19, %18 : vector<16x32xf32>
    %21 = arith.mulf %10, %20 : vector<16x32xf32>
    %c0_10 = arith.constant 0 : index
    %c0_11 = arith.constant 0 : index
    %22 = vector.load %arg10[%c0_10, %c0_11] : memref<16x32xf32, #tpu.memory_space<vmem>>, vector<16x32xf32>
    %c0_12 = arith.constant 0 : index
    %c0_13 = arith.constant 0 : index
    %23 = vector.load %arg5[%c0_12, %c0_13] : memref<32x32xf32, #tpu.memory_space<vmem>>, vector<32x32xf32>
    %cst_14 = arith.constant dense<0.000000e+00> : vector<16x32xf32>
    %24 = tpu.matmul %21, %23, %cst_14 {dimension_numbers = #tpu.dot_dimension_numbers<[1], [0], [0], [1], [0, 0, 1, 1], [], []>} : vector<16x32xf32>, vector<32x32xf32>, vector<16x32xf32> -> vector<16x32xf32>
    %25 = arith.addf %22, %24 : vector<16x32xf32>
    %c0_15 = arith.constant 0 : index
    %c0_16 = arith.constant 0 : index
    %26 = vector.load %arg10[%c0_15, %c0_16] : memref<16x32xf32, #tpu.memory_space<vmem>>, vector<16x32xf32>
    tpu.vector_store %arg10[%c0_15, %c0_16], %25 {strides = array<i32>} : memref<16x32xf32, #tpu.memory_space<vmem>>, vector<16x32xf32>,
    %c0_i32_17 = arith.constant 0 : i32
    %27 = arith.cmpi eq, %arg1, %c0_i32_17 : i32
    %28 = arith.extui %27 : i1 to i32
    %c0_i32_18 = arith.constant 0 : i32
    %29 = arith.cmpi ne, %28, %c0_i32_18 : i32
    scf.if %29 {
      %c0_19 = arith.constant 0 : index
      %c0_20 = arith.constant 0 : index
      %30 = vector.load %arg2[%c0_19, %c0_20] : memref<16x32xf32, #tpu.memory_space<vmem>>, vector<16x32xf32>
      %c0_21 = arith.constant 0 : index
      %c0_22 = arith.constant 0 : index
      %31 = vector.load %arg10[%c0_21, %c0_22] : memref<16x32xf32, #tpu.memory_space<vmem>>, vector<16x32xf32>
      %c0_23 = arith.constant 0 : index
      %c0_24 = arith.constant 0 : index
      %32 = vector.load %arg6[%c0_23, %c0_24] : memref<1x32xf32, #tpu.memory_space<vmem>>, vector<1x32xf32>
      %33 = vector.broadcast %32 : vector<1x32xf32> to vector<16x32xf32>
      %34 = arith.addf %31, %33 : vector<16x32xf32>
      %35 = arith.addf %34, %30 : vector<16x32xf32>
      %cst_25 = arith.constant dense<0.000000e+00> : vector<16xf32>
      %36 = vector.multi_reduction <add>, %35, %cst_25 [1] : vector<16x32xf32> to vector<16xf32>
      %37 = vector.shape_cast %36 : vector<16xf32> to vector<16x1xf32>
      %cst_26 = arith.constant 3.200000e+01 : f32
      %38 = vector.broadcast %cst_26 : f32 to vector<16x1xf32>
      %39 = arith.divf %37, %38 : vector<16x1xf32>
      %40 = arith.mulf %35, %35 : vector<16x32xf32>
      %cst_27 = arith.constant dense<0.000000e+00> : vector<16xf32>
      %41 = vector.multi_reduction <add>, %40, %cst_27 [1] : vector<16x32xf32> to vector<16xf32>
      %42 = vector.shape_cast %41 : vector<16xf32> to vector<16x1xf32>
      %cst_28 = arith.constant 3.200000e+01 : f32
      %43 = vector.broadcast %cst_28 : f32 to vector<16x1xf32>
      %44 = arith.divf %42, %43 : vector<16x1xf32>
      %45 = arith.mulf %39, %39 : vector<16x1xf32>
      %46 = arith.subf %44, %45 : vector<16x1xf32>
      %cst_29 = arith.constant 0.000000e+00 : f32
      %47 = vector.broadcast %cst_29 : f32 to vector<16x1xf32>
      %48 = arith.maximumf %46, %47 : vector<16x1xf32>
      %cst_30 = arith.constant 9.99999974E-6 : f32
      %49 = vector.broadcast %cst_30 : f32 to vector<16x1xf32>
      %50 = arith.addf %48, %49 : vector<16x1xf32>
      %51 = math.rsqrt %50 : vector<16x1xf32>
      %52 = vector.broadcast %39 : vector<16x1xf32> to vector<16x32xf32>
      %53 = arith.subf %35, %52 : vector<16x32xf32>
      %54 = vector.broadcast %51 : vector<16x1xf32> to vector<16x32xf32>
      %55 = arith.mulf %53, %54 : vector<16x32xf32>
      %c0_31 = arith.constant 0 : index
      %c0_32 = arith.constant 0 : index
      %56 = vector.load %arg7[%c0_31, %c0_32] : memref<1x32xf32, #tpu.memory_space<vmem>>, vector<1x32xf32>
      %57 = vector.broadcast %56 : vector<1x32xf32> to vector<16x32xf32>
      %58 = arith.mulf %55, %57 : vector<16x32xf32>
      %c0_33 = arith.constant 0 : index
      %c0_34 = arith.constant 0 : index
      %59 = vector.load %arg8[%c0_33, %c0_34] : memref<1x32xf32, #tpu.memory_space<vmem>>, vector<1x32xf32>
      %60 = vector.broadcast %59 : vector<1x32xf32> to vector<16x32xf32>
      %61 = arith.addf %58, %60 : vector<16x32xf32>
      %c0_35 = arith.constant 0 : index
      %c0_36 = arith.constant 0 : index
      %62 = vector.load %arg9[%c0_35, %c0_36] : memref<16x32xf32, #tpu.memory_space<vmem>>, vector<16x32xf32>
      tpu.vector_store %arg9[%c0_35, %c0_36], %61 {strides = array<i32>} : memref<16x32xf32, #tpu.memory_space<vmem>>, vector<16x32xf32>,
    } else {
    }
    return
  }
  func.func @transform_0(%arg0: i32, %arg1: i32) -> (i32, i32) {
    %c0_i32 = arith.constant 0 : i32
    %c0_i32_0 = arith.constant 0 : i32
    return %arg0, %c0_i32 : i32, i32
  }
  func.func @transform_1(%arg0: i32, %arg1: i32) -> (i32, i32) {
    %c0_i32 = arith.constant 0 : i32
    %c0_i32_0 = arith.constant 0 : i32
    return %c0_i32, %arg1 : i32, i32
  }
  func.func @transform_2(%arg0: i32, %arg1: i32) -> (i32, i32) {
    %c0_i32 = arith.constant 0 : i32
    %c0_i32_0 = arith.constant 0 : i32
    return %c0_i32, %arg1 : i32, i32
  }
  func.func @transform_3(%arg0: i32, %arg1: i32) -> (i32, i32) {
    %c0_i32 = arith.constant 0 : i32
    %c0_i32_0 = arith.constant 0 : i32
    return %arg1, %c0_i32 : i32, i32
  }
  func.func @transform_4(%arg0: i32, %arg1: i32) -> (i32, i32) {
    %c0_i32 = arith.constant 0 : i32
    %c0_i32_0 = arith.constant 0 : i32
    %c0_i32_1 = arith.constant 0 : i32
    return %c0_i32, %c0_i32_0 : i32, i32
  }
  func.func @transform_5(%arg0: i32, %arg1: i32) -> (i32, i32) {
    %c0_i32 = arith.constant 0 : i32
    %c0_i32_0 = arith.constant 0 : i32
    %c0_i32_1 = arith.constant 0 : i32
    return %c0_i32, %c0_i32_0 : i32, i32
  }
  func.func @transform_6(%arg0: i32, %arg1: i32) -> (i32, i32) {
    %c0_i32 = arith.constant 0 : i32
    %c0_i32_0 = arith.constant 0 : i32
    %c0_i32_1 = arith.constant 0 : i32
    return %c0_i32, %c0_i32_0 : i32, i32
  }
  func.func @transform_7(%arg0: i32, %arg1: i32) -> (i32, i32) {
    %c0_i32 = arith.constant 0 : i32
    %c0_i32_0 = arith.constant 0 : i32
    return %arg0, %c0_i32 : i32, i32
  }
}

</mosaic_0001>

<bundles_post_ra>
// kernel: bert_layer_forward.4
= control target key start
LH: loop header
LB: loop body
LE: loop exit
PB: predicated region body
PF: predicated region fallthrough
CT: control target
= control target key end

     0   :  { %8 = vsyncpa [#allocation3], 0  ;;  %s176_s12 = smov [#allocation2]   ;;  %s219_s0 = inlined_call_operand.vmem [shape: f32[16,32], index: 0, kind: input, shape index: {}]   ;;  %s220_s1 = inlined_call_operand.hbm [shape: f32[32,96], index: 1, kind: input, shape index: {}]   ;;  %s221_s2 = inlined_call_operand.vmem [shape: f32[1,96], index: 2, kind: input, shape index: {}]   ;;  %s222_s3 = inlined_call_operand.vmem [shape: f32[16,96], index: 3, kind: output, shape index: {}]  }
   0x1   :  { %s16_s13 = sshll.u32 %s176_s12, 4  ;;  %s17_s13 = int_to_ptr.vmem [resolvable:$true] %s16_s13 }
   0x2   :  { %s162_s14 = scalar_lea.vmem %s17_s13, 512  ;;  %p167_p1 = scmp.lt.s32.totalorder %s17_s13, %s17_s13 }
   0x3   :  { %p163_p0 = scmp.ne.s32.totalorder %s17_s13, %s162_s14  ;;  %p168_p2 = scmp.lt.s32.totalorder %s162_s14, %s162_s14 }
   0x5   :  { %p169_p3 = por %p168_p2, %p167_p1 }
   0x7   :  { %p170_p4 = pnand %p169_p3, %p163_p0 }
   0x9   :  { %173 = shalt.err (!%p170_p4)
}
   0xa   :  { %s177_s15 = smov 128   ;;  %s178_s16 = smov 8  }
   0xb   :  { %22 = dma.hbm_to_vmem [thread:$0]  %s220_s1, 512, %s17_s13, [#allocation3], %s177_s15, %s177_s15, %s178_s16  }
   0xc   :  { %174 = dma.done.wait [#allocation3], 512  }
   0xd   :  { %175 = vsyncadd [#allocation3], 4294966784  ;;  %vm41_vm0 = vcmask 261120   ;;  %v33_v0 = vld [vmem:[#allocation2 + $0x18] sm:$0xff]  ;;  %v32_v1 = vld [vmem:[#allocation2 + $0x10] sm:$0xff]  ;;  %vm123_vm1 = vcmask 785408  }
   0xe   :  { %140 = vmatprep.subr.mxu0 %v33_v0  ;;  %v28_v2 = vld [vmem:[%s219_s0] sm:$0xff]  ;;  %v31_v3 = vld [vmem:[#allocation2 + $0x8] sm:$0xff] }
   0xf   :  { %141 = vmatpush3.msra.mxu0 %v33_v0  ;;  %148 = vmatprep.mubr.msk.f32.mxu0 %vm41_vm0, %v28_v2  ;;  %v30_v4 = vld [vmem:[#allocation2] sm:$0xff]  ;;  %v29_v5 = vld [vmem:[%s219_s0 + $0x8] sm:$0xff] }
  0x10   :  { %142 = vmatprep.subr.mxu0 %v32_v1  ;;  %v131_v6 = vld [vmem:[%s221_s2] ss:$0 sm:$0xff] }
  0x11   :  { %143 = vmatpush3.msra.mxu0 %v32_v1 }
  0x12   :  { %144 = vmatprep.subr.mxu0 %v31_v3 }
  0x13   :  { %145 = vmatpush3.msra.mxu0 %v31_v3 }
  0x14   :  { %146 = vmatprep.subr.mxu0 %v30_v4 }
  0x15   :  { %147 = vmatpush3.msra.mxu0 %v30_v4 }
  0x16   :  { %149 = vmatmul.mubr.msk.f32.vlgmr.msra.gmra.mxu0 %vm41_vm0, %v29_v5 }
  0xd6   :  { %v150_v7 = vpop.f32.mrf.mxu0 }
  0xd7   :  { %v120_v8 = vadd.f32 %v150_v7, %v131_v6 }
  0xd8   :  { %v114_v9 = vpop.f32.mrf.mxu0 }
  0xd9   :  { %125 = vst.msk [vmem:[%s222_s3 + $0x8] sm:$0xff] %vm123_vm1, %v120_v8  ;;  %v115_v10 = vadd.f32 %v131_v6, %v114_v9 }
  0xdb   :  { %124 = vst.msk [vmem:[%s222_s3] sm:$0xff] %vm123_vm1, %v115_v10 }
  0xdc   :  { %130 = vsyncpa [#allocation3], 1 }

// kernel: bert_layer_forward.6
= control target key start
LH: loop header
LB: loop body
LE: loop exit
PB: predicated region body
PF: predicated region fallthrough
CT: control target
= control target key end

     0   :  { %vm33_vm0 = vcmask 261120   ;;  %v344_v10 = vmov 0.0   ;;  %s458_s2 = inlined_call_operand.vmem [shape: f32[32,32], index: 2, kind: input, shape index: {}]   ;;  %s459_s0 = inlined_call_operand.vmem [shape: f32[16,32], index: 0, kind: input, shape index: {}]   ;;  %s460_s4 = inlined_call_operand.vmem [shape: f32[32,32], index: 4, kind: input, shape index: {}]   ;;  %s461_s3 = inlined_call_operand.vmem [shape: f32[1,32], index: 3, kind: input, shape index: {}]   ;;  %s462_s5 = inlined_call_operand.vmem [shape: f32[1,32], index: 5, kind: input, shape index: {}]   ;;  %s463_s1 = inlined_call_operand.vmem [shape: f32[16,32], index: 1, kind: input, shape index: {}]   ;;  %s464_s6 = inlined_call_operand.vmem [shape: f32[1,32], index: 6, kind: input, shape index: {}]   ;;  %s465_s7 = inlined_call_operand.vmem [shape: f32[1,32], index: 7, kind: input, shape index: {}]   ;;  %s466_s8 = inlined_call_operand.vmem [shape: f32[16,32], index: 8, kind: output, shape index: {}]  }
   0x1   :  { %v41_v0 = vld [vmem:[%s458_s2 + $0x18] sm:$0xff]  ;;  %v40_v1 = vld [vmem:[%s458_s2 + $0x10] sm:$0xff]  ;;  %v36_v2 = vld [vmem:[%s459_s0] sm:$0xff]  ;;  %35 = vst.msk [vmem:[#allocation2 + $0x8] sm:$0xff] %vm33_vm0, %v344_v10 }
   0x2   :  { %317 = vmatprep.subr.mxu0 %v41_v0  ;;  %v39_v3 = vld [vmem:[%s458_s2 + $0x8] sm:$0xff]  ;;  %325 = vmatprep.mubr.msk.f32.mxu0 %vm33_vm0, %v36_v2  ;;  %v136_v4 = vld [vmem:[%s460_s4 + $0x18] sm:$0xff]  ;;  %v38_v5 = vld [vmem:[%s458_s2] sm:$0xff]  ;;  %34 = vst.msk [vmem:[#allocation2] sm:$0xff] %vm33_vm0, %v344_v10 }
   0x3   :  { %318 = vmatpush3.msra.mxu0 %v41_v0  ;;  %328 = vmatprep.subr.mxu1 %v136_v4  ;;  %v37_v6 = vld [vmem:[%s459_s0 + $0x8] sm:$0xff]  ;;  %v135_v7 = vld [vmem:[%s460_s4 + $0x10] sm:$0xff]  ;;  %v133_v9 = vld [vmem:[%s460_s4] sm:$0xff] }
   0x4   :  { %319 = vmatprep.subr.mxu0 %v40_v1  ;;  %329 = vmatpush3.msra.mxu1 %v136_v4  ;;  %v134_v8 = vld [vmem:[%s460_s4 + $0x8] sm:$0xff]  ;;  %v297_v12 = vld [vmem:[%s461_s3] ss:$0 sm:$0xff] }
   0x5   :  { %320 = vmatpush3.msra.mxu0 %v40_v1  ;;  %330 = vmatprep.subr.mxu1 %v135_v7  ;;  %v302_v22 = vld [vmem:[%s462_s5] ss:$0 sm:$0xff]  ;;  %v226_v27 = vld [vmem:[%s463_s1 + $0x8] sm:$0xff] }
   0x6   :  { %321 = vmatprep.subr.mxu0 %v39_v3  ;;  %331 = vmatpush3.msra.mxu1 %v135_v7  ;;  %v225_v25 = vld [vmem:[%s463_s1] sm:$0xff] }
   0x7   :  { %322 = vmatpush3.msra.mxu0 %v39_v3  ;;  %332 = vmatprep.subr.mxu1 %v134_v8  ;;  %v303_v55 = vld [vmem:[%s464_s6] ss:$0 sm:$0xff] }
   0x8   :  { %323 = vmatprep.subr.mxu0 %v38_v5  ;;  %333 = vmatpush3.msra.mxu1 %v134_v8  ;;  %v132_v16 = vld [vmem:[#allocation2 + $0x8] sm:$0xff]  ;;  %v304_v57 = vld [vmem:[%s465_s7] ss:$0 sm:$0xff] }
   0x9   :  { %324 = vmatpush3.msra.mxu0 %v38_v5  ;;  %334 = vmatprep.subr.mxu1 %v133_v9  ;;  %v131_v18 = vld [vmem:[#allocation2] sm:$0xff] }
   0xa   :  { %326 = vmatmul.mubr.msk.f32.vlgmr.msra.gmra.mxu0 %vm33_vm0, %v37_v6  ;;  %335 = vmatpush3.msra.mxu1 %v133_v9 }
  0xca   :  { %v327_v11 = vpop.f32.mrf.mxu0 }
  0xcb   :  { %v128_v15 = vadd.f32 %v327_v11, %v297_v12 }
  0xcc   :  { %v122_v13 = vpop.f32.mrf.mxu0 }
  0xcd   :  { %v123_v14 = vadd.f32 %v297_v12, %v122_v13 }
  0xcf   :  { %336 = vmatprep.mubr.msk.f32.mxu1 %vm33_vm0, %v123_v14 }
  0xd0   :  { %337 = vmatmul.mubr.msk.f32.vlgmr.msra.gmra.mxu1 %vm33_vm0, %v128_v15 }
 0x190   :  { %v338_v17 = vpop.f32.mrf.mxu1 }
 0x191   :  { %v219_v19 = vadd.f32 %v338_v17, %v132_v16 }
 0x192   :  { %v209_v20 = vpop.f32.mrf.mxu1 }
 0x193   :  { %221 = vst.msk [vmem:[#allocation2 + $0x8] sm:$0xff] %vm33_vm0, %v219_v19  ;;  %v218_v21 = vadd.f32 %v209_v20, %v131_v18 }
 0x195   :  { %220 = vst.msk [vmem:[#allocation2] sm:$0xff] %vm33_vm0, %v218_v21 }
 0x19a   :  { %v228_v23 = vld [vmem:[#allocation2 + $0x8] sm:$0xff] }
 0x19b   :  { %v237_v24 = vadd.f32 %v302_v22, %v228_v23 }
 0x19c   :  { %v227_v26 = vld [vmem:[#allocation2] sm:$0xff] }
 0x19d   :  { %v236_v28 = vadd.f32 %v302_v22, %v227_v26  ;;  %v239_v30 = vadd.f32 %v237_v24, %v226_v27 }
 0x19f   :  { %v238_v29 = vadd.f32 %v236_v28, %v225_v25  ;;  %v250_v34 = vmul.f32 %v239_v30, %v239_v30  ;;  %v243_v35 = vsel %vm33_vm0, %v239_v30, 0.0 }
 0x1a1   :  { %v240_v31 = vsel %vm33_vm0, %v238_v29, 0.0  ;;  %v249_v32 = vmul.f32 %v238_v29, %v238_v29  ;;  %v254_v36 = vsel %vm33_vm0, %v250_v34, 0.0 }
 0x1a2   :  { %241 = vadd.xlane.f32.xlu0 %v240_v31 }
 0x1a3   :  { %v251_v33 = vsel %vm33_vm0, %v249_v32, 0.0 }
 0x1a4   :  { %252 = vadd.xlane.f32.xlu1 %v251_v33 }
 0x1a6   :  { %244 = vadd.xlane.f32.xlu0 %v243_v35 }
 0x1a8   :  { %255 = vadd.xlane.f32.xlu1 %v254_v36 }
 0x22b   :  { %v242_v37 = vpop.xlane.xlu0 %241 }
 0x22c   :  { %v247_v38 = vmul.f32 0.03125, %v242_v37 }
 0x22d   :  { %v253_v39 = vpop.xlane.xlu1 %252 }
 0x22e   :  { %v259_v40 = vmul.f32 %v247_v38, %v247_v38  ;;  %v257_v41 = vmul.f32 0.03125, %v253_v39  ;;  %v269_v53 = vsub.f32 %v238_v29, %v247_v38 }
 0x22f   :  { %v245_v42 = vpop.xlane.xlu0 %244 }
 0x230   :  { %v261_v43 = vsub.f32 %v257_v41, %v259_v40  ;;  %v248_v44 = vmul.f32 0.03125, %v245_v42 }
 0x231   :  { %v256_v45 = vpop.xlane.xlu1 %255 }
 0x232   :  { %v263_v46 = vmax.f32 %v261_v43, 0.0  ;;  %v260_v47 = vmul.f32 %v248_v44, %v248_v44  ;;  %v258_v48 = vmul.f32 0.03125, %v256_v45  ;;  %v270_v59 = vsub.f32 %v239_v30, %v248_v44 }
 0x234   :  { %v265_v49 = vadd.f32 1e-05, %v263_v46  ;;  %v262_v50 = vsub.f32 %v258_v48, %v260_v47 }
 0x236   :  { %340 = vrsqrt.f32 %v265_v49  ;;  %v264_v51 = vmax.f32 %v262_v50, 0.0 }
 0x238   :  { %v266_v52 = vadd.f32 1e-05, %v264_v51 }
 0x23a   :  { %342 = vrsqrt.f32 %v266_v52 }
 0x243   :  { %v341_v54 = vpop.eup %340 }
 0x244   :  { %v271_v56 = vmul.f32 %v341_v54, %v269_v53 }
 0x246   :  { %v280_v58 = vmul.f32 %v303_v55, %v271_v56 }
 0x247   :  { %v343_v60 = vpop.eup %342 }
 0x248   :  { %v289_v61 = vadd.f32 %v304_v57, %v280_v58  ;;  %v272_v62 = vmul.f32 %v343_v60, %v270_v59 }
 0x24a   :  { %291 = vst.msk [vmem:[%s466_s8] sm:$0xff] %vm33_vm0, %v289_v61  ;;  %v281_v63 = vmul.f32 %v303_v55, %v272_v62 }
 0x24c   :  { %v290_v0 = vadd.f32 %v304_v57, %v281_v63 }
 0x24e   :  { %292 = vst.msk [vmem:[%s466_s8 + $0x8] sm:$0xff] %vm33_vm0, %v290_v0 }

// kernel: bert_layer_forward.5
= control target key start
LH: loop header
LB: loop body
LE: loop exit
PB: predicated region body
PF: predicated region fallthrough
CT: control target
= control target key end

     0   :  { %s1067_s9 = smov 0   ;;  %s1157_s0 = inlined_call_operand.vmem [shape: f32[2,8,96], index: 0, kind: input, shape index: {}]   ;;  %s1158_s1 = inlined_call_operand.vmem [shape: f32[2,1,8], index: 1, kind: input, shape index: {}]   ;;  %s1159_s2 = inlined_call_operand.vmem [shape: f32[2,8,32], index: 2, kind: output, shape index: {}]  }
   0x1 LB: > { %s910_s10 = sadd.s32 4294967295, %s1034_s9   ;;  %p914_p0 = scmp.ge.s32.totalorder %s1034_s9, 1  ;;  %s1034_s9 = sphi %s1067_s9, %s12_s9  }
   0x2   : > { %p119_p1 = scmp.lt.s32.totalorder %s1034_s9, 3 }
   0x4   : > { %p120_p2 = pnand %p914_p0, %p119_p1 }
   0x5   : > { %p142_p3 = scmp.lt.s32.totalorder (!%p120_p2), %s910_s10, 1  ;;  %s1038_s15 = smov (!%p120_p2), 96  }
   0x6   : > { %123 = sbr.rel (%p120_p2) target bundleno = 1473 (0x5c1), region = 28  ;;  %s1039_s16 = smov (!%p120_p2), 64  }
   0x7   : > { %s1040_s17 = smov (!%p120_p2), 88   ;;  %s1041_s18 = smov (!%p120_p2), 120  }
   0x8   : > { %s1042_s19 = smov (!%p120_p2), 80   ;;  %s1043_s23 = smov (!%p120_p2), 72  }
   0x9   : > { %s1044_s24 = smov (!%p120_p2), 112   ;;  %s1045_s25 = smov (!%p120_p2), 104  }
   0xa   : > { %s1046_s26 = smov (!%p120_p2), 56   ;;  %s1047_s27 = smov (!%p120_p2), 40  }
   0xb   : > { %v1036_v0 = vmov 0.0   ;;  %vm1037_vm0 = vmmov 0   ;;  %s1161_s10 = smov (!%p142_p3, %s910_s10), 1  ;;  %vm158_vm1 = vcmask 64512   ;;  %s1048_s28 = smov 48   ;;  %vm842_vm2 = vcmask 130048  }
   0xc   : > { %948 = vmatprep.subr.mxu0 %v1036_v0  ;;  %950 = vmatprep.mubr.msk.f32.mxu0 %vm1037_vm0, %v1036_v0  ;;  %s915_s11 = sshll.u32 %s1161_s10, 3  ;;  %s148_s22 = scalar_lea.vmem %s1158_s1, %s1161_s10  ;;  %vm844_vm3 = vcmask 195584   ;;  %vm846_vm4 = vcmask 261120  }
   0xd   : > { %953 = vmatprep.subr.mxu1 %v1036_v0  ;;  %955 = vmatprep.mubr.msk.f32.mxu1 %vm1037_vm0, %v1036_v0  ;;  %s145_s14 = scalar_lea.vmem %s1157_s0, %s915_s11  ;;  %v919_v4 = vld [vmem:[%s148_s22] ss:$0 sm:$0xff]  ;;  %s1049_s29 = smov 8  }
   0xe   : > { %v1089_v1 = vld [vmem:[%s145_s14] sm:$0xff]  ;;  %s1050_s30 = smov 16   ;;  %s1051_s3 = smov 24  }
   0xf   : > { %156 = vrot.lane.b32.xlu0 %v1089_v1, %s1038_s15  ;;  %252 = vrot.lane.b32.xlu1 %v1089_v1, %s1039_s16  ;;  %s152_s6 = scalar_lea.vmem %s1159_s2, %s915_s11 }
  0x13   : > { %330 = vrot.lane.b32.xlu1 %v1089_v1, %s1040_s17 }
  0x17   : > { %328 = vrot.lane.b32.xlu1 %v1089_v1, %s1041_s18 }
  0x1b   : > { %497 = vrot.lane.b32.xlu1 %v1089_v1, %s1042_s19 }
  0x81   : > { %v157_v2 = vpop.permute.xlu0 %156  ;;  %v253_v9 = vpop.permute.xlu1 %252 }
  0x82   : > { %949 = vmatpush3.xpose.msk.msra.mxu0 %vm158_vm1, %v157_v2  ;;  %954 = vmatpush3.msra.mxu1 %v253_v9 }
  0x83   : > { %963 = vmatprep.subr.mxu0 %v1036_v0  ;;  %958 = vmatprep.subr.mxu1 %v1036_v0 }
  0x85   : > { %951 = vmatmul.mubr.msk.f32.vlgmr.msra.gmra.mxu0 %vm158_vm1, %v1089_v1  ;;  %v331_v15 = vpop.permute.xlu1 %330 }
  0x86   : > { %965 = vmatprep.mubr.msk.f32.mxu0 %vm1037_vm0, %v1036_v0 }
  0x89   : > { %v329_v16 = vpop.permute.xlu1 %328 }
  0x8d   : > { %v498_v17 = vpop.permute.xlu1 %497 }
 0x145   : > { %v229_v3 = vpop.f32.mrf.mxu0 }
 0x146   : > { %v233_v5 = vmul.f32 0.35355338, %v229_v3 }
 0x147   : > { %v952_v6 = vpop.f32.mrf.mxu0 }
 0x148   : > { %v240_v7 = vadd.f32 %v919_v4, %v233_v5 }
 0x14a   : > { %v241_v8 = vsel %vm158_vm1, %v240_v7, -inf }
 0x14b   : > { %242 = vmax.xlane.f32.xlu0 %v241_v8 }
 0x161   : > { %664 = vrot.lane.b32.xlu0 %v1089_v1, %s1043_s23 }
 0x1d4   : > { %v243_v10 = vpop.xlane.xlu0 %242 }
 0x1d5   : > { %v244_v11 = vsub.f32 %v240_v7, %v243_v10 }
 0x1d7   : > { %v245_v12 = vmul.f32 1.442695, %v244_v11 }
 0x1d8   : > { %v665_v22 = vpop.permute.xlu0 %664 }
 0x1d9   : > { %1012 = vpow2.f32 %v245_v12 }
 0x1e6   : > { %v1013_v13 = vpop.eup %1012 }
 0x1e7   : > { %v247_v14 = vsel %vm158_vm1, %v1013_v13, 0.0 }
 0x1e8   : > { %248 = vadd.xlane.f32.xlu1 %v247_v14 }
 0x1f9   : > { %495 = vrot.lane.b32.xlu1 %v1089_v1, %s1044_s24 }
 0x1fd   : > { %662 = vrot.lane.b32.xlu1 %v1089_v1, %s1045_s25 }
 0x271   : > { %v249_v18 = vpop.xlane.xlu1 %248 }
 0x272   : > { %1014 = vrcp.f32 %v249_v18 }
 0x275   : > { %v496_v21 = vpop.permute.xlu1 %495 }
 0x279   : > { %v663_v23 = vpop.permute.xlu1 %662 }
 0x27f   : > { %v1015_v19 = vpop.eup %1014 }
 0x280   : > { %v251_v20 = vmul.f32 %v1015_v19, %v1013_v13 }
 0x282   : > { %956 = vmatmul.mubr.msk.f32.vlgmr.msra.gmra.mxu1 %vm158_vm1, %v251_v20 }
 0x283   : > { %959 = vmatpush3.xpose.msk.msra.mxu1 %vm158_vm1, %v331_v15  ;;  %960 = vmatprep.mubr.msk.f32.mxu1 %vm1037_vm0, %v1036_v0 }
 0x284   : > { %968 = vmatprep.subr.mxu1 %v1036_v0 }
 0x286   : > { %961 = vmatmul.mubr.msk.f32.vlgmr.msra.gmra.mxu1 %vm158_vm1, %v329_v16 }
 0x287   : > { %969 = vmatpush3.xpose.msk.msra.mxu1 %vm158_vm1, %v498_v17  ;;  %970 = vmatprep.mubr.msk.f32.mxu1 %vm1037_vm0, %v1036_v0 }
 0x288   : > { %978 = vmatprep.subr.mxu1 %v1036_v0 }
 0x28a   : > { %971 = vmatmul.mubr.msk.f32.vlgmr.msra.gmra.mxu1 %vm158_vm1, %v496_v21 }
 0x28b   : > { %979 = vmatpush3.xpose.msk.msra.mxu1 %vm158_vm1, %v665_v22  ;;  %980 = vmatprep.mubr.msk.f32.mxu1 %vm1037_vm0, %v1036_v0 }
 0x28e   : > { %981 = vmatmul.mubr.msk.f32.vlgmr.msra.gmra.mxu1 %vm158_vm1, %v663_v23 }
 0x342   : > { %v1127_v24 = vpop.f32.mrf.mxu1 }
 0x344   : > { %v957_v25 = vpop.f32.mrf.mxu1 }
 0x346   : > { %v402_v26 = vpop.f32.mrf.mxu1 }
 0x347   : > { %v406_v27 = vmul.f32 0.35355338, %v402_v26 }
 0x348   : > { %v962_v28 = vpop.f32.mrf.mxu1 }
 0x349   : > { %v407_v29 = vadd.f32 %v919_v4, %v406_v27 }
 0x34a   : > { %v569_v30 = vpop.f32.mrf.mxu1 }
 0x34b   : > { %v573_v31 = vmul.f32 0.35355338, %v569_v30  ;;  %v408_v32 = vsel %vm158_vm1, %v407_v29, -inf }
 0x34c   : > { %409 = vmax.xlane.f32.xlu1 %v408_v32  ;;  %v972_v33 = vpop.f32.mrf.mxu1 }
 0x34d   : > { %v574_v34 = vadd.f32 %v919_v4, %v573_v31 }
 0x34e   : > { %v736_v35 = vpop.f32.mrf.mxu1 }
 0x34f   : > { %v740_v36 = vmul.f32 0.35355338, %v736_v35  ;;  %v575_v37 = vsel %vm158_vm1, %v574_v34, -inf }
 0x350   : > { %576 = vmax.xlane.f32.xlu0 %v575_v37  ;;  %v982_v38 = vpop.f32.mrf.mxu1 }
 0x351   : > { %v741_v39 = vadd.f32 %v919_v4, %v740_v36 }
 0x353   : > { %v742_v40 = vsel %vm158_vm1, %v741_v39, -inf }
 0x354   : > { %743 = vmax.xlane.f32.xlu1 %v742_v40 }
 0x365   : > { %419 = vrot.lane.b32.xlu1 %v1089_v1, %s1046_s26 }
 0x3d5   : > { %v410_v41 = vpop.xlane.xlu1 %409 }
 0x3d6   : > { %v411_v42 = vsub.f32 %v407_v29, %v410_v41 }
 0x3d8   : > { %v412_v43 = vmul.f32 1.442695, %v411_v42 }
 0x3d9   : > { %v577_v44 = vpop.xlane.xlu0 %576 }
 0x3da   : > { %1016 = vpow2.f32 %v412_v43  ;;  %v578_v45 = vsub.f32 %v574_v34, %v577_v44 }
 0x3dc   : > { %v579_v46 = vmul.f32 1.442695, %v578_v45 }
 0x3dd   : > { %v744_v47 = vpop.xlane.xlu1 %743 }
 0x3de   : > { %1018 = vpow2.f32 %v579_v46  ;;  %v745_v48 = vsub.f32 %v741_v39, %v744_v47 }
 0x3e0   : > { %v746_v49 = vmul.f32 1.442695, %v745_v48 }
 0x3e1   : > { %v420_v50 = vpop.permute.xlu1 %419 }
 0x3e2   : > { %1020 = vpow2.f32 %v746_v49  ;;  %964 = vmatpush3.msra.mxu0 %v420_v50 }
 0x3e3   : > { %973 = vmatprep.subr.mxu0 %v1036_v0 }
 0x3e7   : > { %v1017_v51 = vpop.eup %1016 }
 0x3e8   : > { %v414_v52 = vsel %vm158_vm1, %v1017_v51, 0.0 }
 0x3e9   : > { %415 = vadd.xlane.f32.xlu1 %v414_v52 }
 0x3eb   : > { %v1019_v53 = vpop.eup %1018 }
 0x3ec   : > { %v581_v54 = vsel %vm158_vm1, %v1019_v53, 0.0 }
 0x3ed   : > { %582 = vadd.xlane.f32.xlu1 %v581_v54 }
 0x3ef   : > { %v1021_v55 = vpop.eup %1020 }
 0x3f0   : > { %v748_v56 = vsel %vm158_vm1, %v1021_v55, 0.0 }
 0x3f1   : > { %749 = vadd.xlane.f32.xlu0 %v748_v56 }
 0x3fe   : > { %753 = vrot.lane.b32.xlu1 %v1089_v1, %s1047_s27 }
 0x407   : > { %586 = vrot.lane.b32.xlu0 %v1089_v1, %s1048_s28 }
 0x472   : > { %v416_v57 = vpop.xlane.xlu1 %415 }
 0x473   : > { %1022 = vrcp.f32 %v416_v57 }
 0x476   : > { %v583_v58 = vpop.xlane.xlu1 %582 }
 0x477   : > { %1024 = vrcp.f32 %v583_v58 }
 0x47a   : > { %v750_v59 = vpop.xlane.xlu0 %749  ;;  %v754_v2 = vpop.permute.xlu1 %753 }
 0x47b   : > { %1026 = vrcp.f32 %v750_v59 }
 0x47e   : > { %v587_v61 = vpop.permute.xlu0 %586 }
 0x480   : > { %v1023_v60 = vpop.eup %1022 }
 0x481   : > { %v418_v62 = vmul.f32 %v1023_v60, %v1017_v51 }
 0x483   : > { %966 = vmatmul.mubr.msk.f32.vlgmr.msra.gmra.mxu0 %vm158_vm1, %v418_v62 }
 0x484   : > { %v1025_v63 = vpop.eup %1024  ;;  %974 = vmatpush3.msra.mxu0 %v587_v61  ;;  %975 = vmatprep.mubr.msk.f32.mxu0 %vm1037_vm0, %v1036_v0 }
 0x485   : > { %983 = vmatprep.subr.mxu0 %v1036_v0  ;;  %v585_v1 = vmul.f32 %v1025_v63, %v1019_v53 }
 0x487   : > { %976 = vmatmul.mubr.msk.f32.vlgmr.msra.gmra.mxu0 %vm158_vm1, %v585_v1 }
 0x488   : > { %v1027_v3 = vpop.eup %1026  ;;  %984 = vmatpush3.msra.mxu0 %v754_v2  ;;  %985 = vmatprep.mubr.msk.f32.mxu0 %vm1037_vm0, %v1036_v0 }
 0x489   : > { %v752_v4 = vmul.f32 %v1027_v3, %v1021_v55 }
 0x48b   : > { %986 = vmatmul.mubr.msk.f32.vlgmr.msra.gmra.mxu0 %vm158_vm1, %v752_v4 }
 0x543   : > { %v491_v5 = vpop.f32.mrf.mxu0 }
 0x544   : > { %830 = vrot.lane.b32.xlu1 %v491_v5, %s1049_s29 }
 0x545   : > { %v967_v6 = vpop.f32.mrf.mxu0 }
 0x547   : > { %v658_v7 = vpop.f32.mrf.mxu0 }
 0x548   : > { %834 = vrot.lane.b32.xlu0 %v658_v7, %s1050_s30 }
 0x549   : > { %v977_v8 = vpop.f32.mrf.mxu0 }
 0x54b   : > { %v825_v9 = vpop.f32.mrf.mxu0 }
 0x54c   : > { %838 = vrot.lane.b32.xlu1 %v825_v9, %s1051_s3 }
 0x54d   : > { %v987_v10 = vpop.f32.mrf.mxu0 }
 0x5b6   : > { %v831_v11 = vpop.permute.xlu1 %830 }
 0x5b7   : > { %v841_v0 = vsel %vm158_vm1, %v1127_v24, %v831_v11 }
 0x5ba   : > { %v835_v12 = vpop.permute.xlu0 %834 }
 0x5bb   : > { %v843_v13 = vsel %vm842_vm2, %v841_v0, %v835_v12 }
 0x5be   : > { %v839_v14 = vpop.permute.xlu1 %838 }
 0x5bf   : > { %v845_v15 = vsel %vm844_vm3, %v843_v13, %v839_v14 }
 0x5c0   : > { %847 = vst.msk [vmem:[%s152_s6] sm:$0xff] %vm846_vm4, %v845_v15 }
 0x5c1 PF: > { %s12_s9 = sadd.s32 1, %s1034_s9  }
 0x5c2   : > { %p9_p4 = scmp.ge.s32.totalorder %s12_s9, 4  }
 0x5c4   :  { %11 = sbr.rel (!%p9_p4) target bundleno = 1 (0x1), region = 61 }

// kernel: bert_layer_forward.7
= control target key start
LH: loop header
LB: loop body
LE: loop exit
PB: predicated region body
PF: predicated region fallthrough
CT: control target
= control target key end

     0   :  { %vm31_vm0 = vcmask 261120   ;;  %s508_s0 = inlined_call_operand.vmem [shape: f32[16,32], index: 0, kind: input, shape index: {}]   ;;  %s509_s1 = inlined_call_operand.vmem [shape: f32[32,32], index: 1, kind: input, shape index: {}]   ;;  %s510_s2 = inlined_call_operand.vmem [shape: f32[1,32], index: 2, kind: input, shape index: {}]   ;;  %s511_s3 = inlined_call_operand.vmem [shape: f32[32,32], index: 3, kind: input, shape index: {}]   ;;  %s512_s4 = inlined_call_operand.vmem [shape: f32[1,32], index: 4, kind: input, shape index: {}]   ;;  %s513_s5 = inlined_call_operand.vmem [shape: f32[1,32], index: 5, kind: input, shape index: {}]   ;;  %s514_s6 = inlined_call_operand.vmem [shape: f32[1,32], index: 6, kind: input, shape index: {}]   ;;  %s515_s7 = inlined_call_operand.hbm [shape: f32[16,32], index: 7, kind: output, shape index: {}]  }
   0x1   :  { %v39_v0 = vld [vmem:[%s509_s1 + $0x18] sm:$0xff]  ;;  %v38_v1 = vld [vmem:[%s509_s1 + $0x10] sm:$0xff]  ;;  %v454_v2 = vld [vmem:[%s508_s0] sm:$0xff] }
   0x2   :  { %345 = vmatprep.subr.mxu0 %v39_v0  ;;  %v37_v3 = vld [vmem:[%s509_s1 + $0x8] sm:$0xff]  ;;  %353 = vmatprep.mubr.msk.f32.mxu0 %vm31_vm0, %v454_v2 }
   0x3   :  { %346 = vmatpush3.msra.mxu0 %v39_v0 }
   0x4   :  { %12 = vsyncpa [#allocation4], 0  ;;  %347 = vmatprep.subr.mxu0 %v38_v1  ;;  %v36_v4 = vld [vmem:[%s509_s1] sm:$0xff]  ;;  %v35_v5 = vld [vmem:[%s508_s0 + $0x8] sm:$0xff]  ;;  %v401_v10 = vmov 0.0   ;;  %s402_s24 = smov [#allocation3]  }
   0x5   :  { %348 = vmatpush3.msra.mxu0 %v38_v1  ;;  %v152_v6 = vld [vmem:[%s511_s3 + $0x18] sm:$0xff]  ;;  %v151_v7 = vld [vmem:[%s511_s3 + $0x10] sm:$0xff]  ;;  %v150_v8 = vld [vmem:[%s511_s3 + $0x8] sm:$0xff]  ;;  %33 = vst.msk [vmem:[#allocation2 + $0x8] sm:$0xff] %vm31_vm0, %v401_v10  ;;  %s314_s25 = sshll.u32 %s402_s24, 4  ;;  %s315_s25 = int_to_ptr.vmem [resolvable:$true] %s314_s25 }
   0x6   :  { %349 = vmatprep.subr.mxu0 %v37_v3  ;;  %356 = vmatprep.subr.mxu1 %v152_v6  ;;  %v149_v9 = vld [vmem:[%s511_s3] sm:$0xff]  ;;  %32 = vst.msk [vmem:[#allocation2] sm:$0xff] %vm31_vm0, %v401_v10  ;;  %p384_p1 = scmp.lt.s32.totalorder %s315_s25, %s315_s25 }
   0x7   :  { %350 = vmatpush3.msra.mxu0 %v37_v3  ;;  %357 = vmatpush3.msra.mxu1 %v152_v6  ;;  %v325_v11 = vld [vmem:[%s510_s2] ss:$0 sm:$0xff] }
   0x8   :  { %351 = vmatprep.subr.mxu0 %v36_v4  ;;  %358 = vmatprep.subr.mxu1 %v151_v7  ;;  %v330_v40 = vld [vmem:[%s512_s4] ss:$0 sm:$0xff] }
   0x9   :  { %352 = vmatpush3.msra.mxu0 %v36_v4  ;;  %359 = vmatpush3.msra.mxu1 %v151_v7  ;;  %v331_v7 = vld [vmem:[%s513_s5] ss:$0 sm:$0xff]  ;;  %s379_s5 = scalar_lea.vmem %s315_s25, 256 }
   0xa   :  { %354 = vmatmul.mubr.msk.f32.vlgmr.msra.gmra.mxu0 %vm31_vm0, %v35_v5  ;;  %360 = vmatprep.subr.mxu1 %v150_v8  ;;  %p380_p0 = scmp.ne.s32.totalorder %s315_s25, %s379_s5  ;;  %p385_p2 = scmp.lt.s32.totalorder %s379_s5, %s379_s5 }
   0xb   :  { %361 = vmatpush3.msra.mxu1 %v150_v8 }
   0xc   :  { %362 = vmatprep.subr.mxu1 %v149_v9  ;;  %v148_v34 = vld [vmem:[#allocation2 + $0x8] sm:$0xff]  ;;  %p386_p3 = por %p385_p2, %p384_p1 }
   0xd   :  { %363 = vmatpush3.msra.mxu1 %v149_v9  ;;  %v147_v36 = vld [vmem:[#allocation2] sm:$0xff] }
   0xe   :  { %v332_v9 = vld [vmem:[%s514_s6] ss:$0 sm:$0xff]  ;;  %p387_p4 = pnand %p386_p3, %p380_p0 }
  0xca   :  { %v355_v12 = vpop.f32.mrf.mxu0 }
  0xcb   :  { %v126_v13 = vadd.f32 %v355_v12, %v325_v11 }
  0xcc   :  { %v120_v14 = vpop.f32.mrf.mxu0 }
  0xcd   :  { %v132_v15 = vmul.f32 0.044715, %v126_v13  ;;  %v121_v16 = vadd.f32 %v325_v11, %v120_v14  ;;  %v130_v31 = vmul.f32 0.5, %v126_v13 }
  0xcf   :  { %v134_v17 = vmul.f32 %v132_v15, %v126_v13  ;;  %v131_v18 = vmul.f32 0.044715, %v121_v16  ;;  %v129_v29 = vmul.f32 0.5, %v121_v16 }
  0xd1   :  { %v136_v19 = vmul.f32 %v134_v17, %v126_v13  ;;  %v133_v20 = vmul.f32 %v131_v18, %v121_v16 }
  0xd3   :  { %v138_v21 = vadd.f32 %v136_v19, %v126_v13  ;;  %v135_v22 = vmul.f32 %v133_v20, %v121_v16 }
  0xd5   :  { %v137_v23 = vadd.f32 %v135_v22, %v121_v16  ;;  %v140_v24 = vmul.f32 0.7978846, %v138_v21 }
  0xd7   :  { %v139_v25 = vmul.f32 0.7978846, %v137_v23  ;;  %371 = vtanh.f32 %v140_v24 }
  0xd9   :  { %373 = vtanh.f32 %v139_v25 }
  0xe4   :  { %v372_v26 = vpop.eup %371 }
  0xe5   :  { %v144_v28 = vadd.f32 1.0, %v372_v26 }
  0xe6   :  { %v374_v27 = vpop.eup %373 }
  0xe7   :  { %v143_v30 = vadd.f32 1.0, %v374_v27  ;;  %v146_v33 = vmul.f32 %v144_v28, %v130_v31 }
  0xe9   :  { %v145_v32 = vmul.f32 %v143_v30, %v129_v29 }
  0xeb   :  { %364 = vmatprep.mubr.msk.f32.mxu1 %vm31_vm0, %v145_v32 }
  0xec   :  { %365 = vmatmul.mubr.msk.f32.vlgmr.msra.gmra.mxu1 %vm31_vm0, %v146_v33 }
 0x1ac   :  { %v366_v35 = vpop.f32.mrf.mxu1 }
 0x1ad   :  { %v235_v37 = vadd.f32 %v366_v35, %v148_v34 }
 0x1ae   :  { %v225_v38 = vpop.f32.mrf.mxu1 }
 0x1af   :  { %237 = vst.msk [vmem:[#allocation2 + $0x8] sm:$0xff] %vm31_vm0, %v235_v37  ;;  %v234_v39 = vadd.f32 %v225_v38, %v147_v36 }
 0x1b1   :  { %236 = vst.msk [vmem:[#allocation2] sm:$0xff] %vm31_vm0, %v234_v39 }
 0x1b6   :  { %v244_v41 = vld [vmem:[#allocation2 + $0x8] sm:$0xff] }
 0x1b7   :  { %v253_v42 = vadd.f32 %v330_v40, %v244_v41 }
 0x1b8   :  { %v243_v43 = vld [vmem:[#allocation2] sm:$0xff] }
 0x1b9   :  { %v252_v44 = vadd.f32 %v330_v40, %v243_v43  ;;  %v255_v46 = vadd.f32 %v253_v42, %v35_v5 }
 0x1bb   :  { %v254_v45 = vadd.f32 %v252_v44, %v454_v2  ;;  %v266_v50 = vmul.f32 %v255_v46, %v255_v46  ;;  %v259_v51 = vsel %vm31_vm0, %v255_v46, 0.0 }
 0x1bd   :  { %v256_v47 = vsel %vm31_vm0, %v254_v45, 0.0  ;;  %v265_v48 = vmul.f32 %v254_v45, %v254_v45  ;;  %v270_v52 = vsel %vm31_vm0, %v266_v50, 0.0 }
 0x1be   :  { %257 = vadd.xlane.f32.xlu0 %v256_v47 }
 0x1bf   :  { %v267_v49 = vsel %vm31_vm0, %v265_v48, 0.0 }
 0x1c0   :  { %268 = vadd.xlane.f32.xlu1 %v267_v49 }
 0x1c2   :  { %260 = vadd.xlane.f32.xlu0 %v259_v51 }
 0x1c4   :  { %271 = vadd.xlane.f32.xlu1 %v270_v52 }
 0x247   :  { %v258_v53 = vpop.xlane.xlu0 %257 }
 0x248   :  { %v263_v54 = vmul.f32 0.03125, %v258_v53 }
 0x249   :  { %v269_v55 = vpop.xlane.xlu1 %268 }
 0x24a   :  { %v275_v56 = vmul.f32 %v263_v54, %v263_v54  ;;  %v273_v57 = vmul.f32 0.03125, %v269_v55  ;;  %v285_v5 = vsub.f32 %v254_v45, %v263_v54 }
 0x24b   :  { %v261_v58 = vpop.xlane.xlu0 %260 }
 0x24c   :  { %v277_v59 = vsub.f32 %v273_v57, %v275_v56  ;;  %v264_v60 = vmul.f32 0.03125, %v261_v58 }
 0x24d   :  { %v272_v61 = vpop.xlane.xlu1 %271 }
 0x24e   :  { %v279_v62 = vmax.f32 %v277_v59, 0.0  ;;  %v276_v63 = vmul.f32 %v264_v60, %v264_v60  ;;  %v274_v0 = vmul.f32 0.03125, %v272_v61  ;;  %v286_v10 = vsub.f32 %v255_v46, %v264_v60 }
 0x250   :  { %v281_v1 = vadd.f32 1e-05, %v279_v62  ;;  %v278_v2 = vsub.f32 %v274_v0, %v276_v63 }
 0x252   :  { %375 = vrsqrt.f32 %v281_v1  ;;  %v280_v3 = vmax.f32 %v278_v2, 0.0 }
 0x254   :  { %v282_v4 = vadd.f32 1e-05, %v280_v3 }
 0x256   :  { %377 = vrsqrt.f32 %v282_v4 }
 0x25f   :  { %v376_v6 = vpop.eup %375 }
 0x260   :  { %v287_v8 = vmul.f32 %v376_v6, %v285_v5 }
 0x262   :  { %v296_v11 = vmul.f32 %v331_v7, %v287_v8 }
 0x263   :  { %v378_v12 = vpop.eup %377 }
 0x264   :  { %v288_v13 = vmul.f32 %v378_v12, %v286_v10  ;;  %v305_v14 = vadd.f32 %v332_v9, %v296_v11 }
 0x266   :  { %v297_v15 = vmul.f32 %v331_v7, %v288_v13  ;;  %307 = vst.msk [vmem:[#allocation3] sm:$0xff] %vm31_vm0, %v305_v14 }
 0x268   :  { %v306_v16 = vadd.f32 %v332_v9, %v297_v15 }
 0x26a   :  { %308 = vst.msk [vmem:[#allocation3 + $0x8] sm:$0xff] %vm31_vm0, %v306_v16 }
 0x26b   :  { %390 = shalt.err (!%p387_p4)
}
 0x26c   :  { %s403_s6 = smov 128   ;;  %s404_s26 = smov 8  }
 0x26d   :  { %320 = dma.vmem_to_hbm [thread:$0]  %s315_s25, 256, %s515_s7, [#allocation4], %s403_s6, %s403_s6, %s404_s26  }
 0x26e   :  { %399 = dma.done.wait [#allocation4], 256  }
 0x26f   :  { %400 = vsyncadd [#allocation4], 4294967040 }
 0x270   :  { %324 = vsyncpa [#allocation4], 1 }

</bundles_post_ra>
